<compile_context>
chip_gen: v6e
topology: v6e:2x2x1
jax: 0.10.0
libtpu: 0.0.40
codegen_flags: <defaults>
</compile_context>

<pallas_src>
import functools

import jax
import jax.numpy as jnp
from jax import lax
from jax.experimental import pallas as pl
from jax.experimental.pallas import tpu as pltpu


# --------------------------------------------------------------------------- #
# Small helpers
# --------------------------------------------------------------------------- #
def _round_up(x, m):
    return ((x + m - 1) // m) * m


def _cdiv(a, b):
    return (a + b - 1) // b


def _sublane(dtype):
    # Sublane granularity: 8 for 4-byte, 16 for 2-byte, 32 for 1-byte dtypes.
    return max(8, 32 // jnp.dtype(dtype).itemsize)


def _normalize_pair(v):
    return (v, v) if isinstance(v, int) else tuple(v)


def _fold_bn(gamma, beta, running_mean, running_var, eps):
    scale = (gamma / jnp.sqrt(running_var + eps)).astype(jnp.float32)   # (C,)
    shift = (beta - running_mean * scale).astype(jnp.float32)           # (C,)
    return scale, shift


# --------------------------------------------------------------------------- #
# Kernels
# --------------------------------------------------------------------------- #
def _gdconv_global_nchw_kernel(x_ref, w_ref, shift_ref, o_ref):
    """NCHW-resident global depthwise conv + folded BN.

    x_ref:     (Bn, Ct, S)  input block, spatial S = H*W on lanes
    w_ref:     (Ct, S)      depthwise filters (BN scale + padding pre-folded)
    shift_ref: (1, Ct)      folded BatchNorm shift (f32)
    o_ref:     (Bn, Ct)     lane-dense output slab
    """
    xw = x_ref[...] * w_ref[...][None]                 # [R6] bf16 stays bf16
    acc = jnp.sum(xw.astype(jnp.float32), axis=-1)     # f32 accumulate
    o_ref[...] = (acc + shift_ref[...]).astype(o_ref.dtype)


def _gdconv_global_cl_kernel(x_ref, w_ref, shift_ref, o_ref):
    """Channels-last global depthwise conv + folded BN  [R1].

    x_ref:     (Bn, S, Ct)  channels on lanes, spatial on sublanes
    w_ref:     (S, Ct)
    shift_ref: (1, Ct)
    o_ref:     (Bn, Ct)

    The reduction over S is a sublane reduction (mostly VALU adds), so the
    kernel is HBM-bound instead of XLU-bound, and all 128 lanes are live.
    """
    xw = x_ref[...] * w_ref[...][None]
    acc = jnp.sum(xw.astype(jnp.float32), axis=1)
    o_ref[...] = (acc + shift_ref[...]).astype(o_ref.dtype)


def _gdconv_general_kernel(x_ref, w_ref, shift_ref, o_ref, acc_ref,
                           *, KH, KW, OH, OW):
    # Fallback for non-global configs (OH/OW > 1; not the GDConv hot path).
    # x_ref: (1, Hp, Wp, Ct) padded NHWC tile; w_ref: (KH*KW, Ct) (scale folded)
    # shift_ref: (1, Ct); o_ref: (1, OH, OW, Ct)
    # [R8] acc_ref: VMEM scratch (OH, OW, Ct) f32 bounds vreg live ranges.
    acc_ref[...] = jnp.zeros_like(acc_ref)
    for kh in range(KH):
        for kw in range(KW):
            patch = x_ref[0, kh:kh + OH, kw:kw + OW, :].astype(jnp.float32)
            acc_ref[...] += patch * w_ref[kh * KW + kw, :].astype(jnp.float32)
    # TODO(synk): the kw slices are sublane-misaligned and each materializes a
    # VMEM copy; acceptable for the non-global fallback only.
    o_ref[0] = (acc_ref[...] + shift_ref[0, :]).astype(o_ref.dtype)


# --------------------------------------------------------------------------- #
# Tiling helper (padding-aware VMEM budgeting)
# --------------------------------------------------------------------------- #
def _choose_global_tiles(N, C, S, dtype, *, channels_on_lanes,
                         target_bytes=4 << 20):
    """Pick (batch tile Bn, channel tile Ct) for the global-conv kernels.

    [R3] targets ~4 MiB of x payload per grid step.
    [R4] budgets with the padded VMEM block size, not raw bytes.
    [R5] guarantees >= 2 grid blocks whenever the shape allows it.
    Constraints kept satisfied:
      * Ct is either C or a multiple of 128,
      * Bn is either N or a multiple of the sublane granularity.
    """
    itemsize = jnp.dtype(dtype).itemsize
    sub = _sublane(dtype)

    def img_bytes(ct):
        if channels_on_lanes:   # x block (Bn, S, Ct): sublanes=S, lanes=Ct
            return _round_up(S, sub) * _round_up(ct, 128) * itemsize
        # x block (Bn, Ct, S): sublanes=Ct, lanes=S
        return _round_up(ct, sub) * _round_up(S, 128) * itemsize

    Ct = C
    if C % 128 == 0:
        while Ct % 256 == 0 and img_bytes(Ct) > target_bytes:
            Ct //= 2

    Bn = max(1, target_bytes // img_bytes(Ct))
    if Bn >= N:
        Bn = N
    else:
        Bn = max(sub, (Bn // sub) * sub)
        if Bn > N:
            Bn = N

    # [R5] minimum-grid rule: both v7x TensorCores share the chip's HBM.
    if _cdiv(N, Bn) * _cdiv(C, Ct) < 2:
        if C % 256 == 0:
            Ct = C // 2
        elif N > 1:
            half = _round_up(_cdiv(N, 2), sub)
            if half < N:
                Bn = half
    return int(Bn), int(Ct)


def _global_cost(N, C, S, x_dtype, w_dtype):
    item_x = jnp.dtype(x_dtype).itemsize
    item_w = jnp.dtype(w_dtype).itemsize
    return pl.CostEstimate(                                        # [R7]
        flops=2 * N * C * S + N * C,
        transcendentals=0,
        bytes_accessed=(N * C * S * item_x + C * S * item_w
                        + C * 4 + N * C * item_x))


# --------------------------------------------------------------------------- #
# Global-conv wrappers
# --------------------------------------------------------------------------- #
def _gdconv_global_nchw(x, weight, scale, shift, *, KH, KW, PH, PW):
    """Global depthwise conv (+BN), NCHW input, output spatial size 1x1."""
    N, C, H, W = x.shape
    S = H * W

    # Zero padding only ever multiplies filter taps outside the real image, so
    # it is equivalent to cropping the filter to the image window:
    #   y[n, c] = sum_{h,w} x[n,c,h,w] * weight[c,0,h+PH,w+PW].
    w_eff = weight[:, 0, PH:PH + H, PW:PW + W].astype(jnp.float32)   # (C, H, W)
    w_eff = (w_eff * scale[:, None, None]).reshape(C, S)             # BN scale folded
    w_eff = w_eff.astype(x.dtype)                                    # [R6]
    shift2d = shift.reshape(1, C).astype(jnp.float32)

    x_flat = x.reshape(N, C, S)        # free reshape (NCHW is contiguous)

    Bn, Ct = _choose_global_tiles(N, C, S, x.dtype, channels_on_lanes=False)
    grid = (_cdiv(C, Ct), _cdiv(N, Bn))          # [R2] channels outer, batch inner

    out = pl.pallas_call(
        _gdconv_global_nchw_kernel,
        out_shape=jax.ShapeDtypeStruct((N, C), x.dtype),
        grid=grid,
        in_specs=[
            pl.BlockSpec((Bn, Ct, S), lambda c, b: (b, c, 0)),
            pl.BlockSpec((Ct, S), lambda c, b: (c, 0)),     # constant over inner axis
            pl.BlockSpec((1, Ct), lambda c, b: (0, c)),
        ],
        out_specs=pl.BlockSpec((Bn, Ct), lambda c, b: (b, c)),
        compiler_params=pltpu.CompilerParams(
            dimension_semantics=("parallel", "parallel"),
            vmem_limit_bytes=32 * 1024 * 1024),             # [R9]
        cost_estimate=_global_cost(N, C, S, x.dtype, w_eff.dtype),
    )(x_flat, w_eff, shift2d)

    # 1x1 spatial output: NCHW conversion is a pure (free) reshape.
    return out.reshape(N, C, 1, 1)


def _gdconv_global_cl(x_sc, weight, scale, shift, *, H, W, PH, PW):
    """Global depthwise conv (+BN), channels-last (N, S, C) input  [R1]."""
    N, S, C = x_sc.shape
    w_eff = weight[:, 0, PH:PH + H, PW:PW + W].astype(jnp.float32)
    w_eff = (w_eff * scale[:, None, None]).reshape(C, S)
    w_eff_t = jnp.transpose(w_eff, (1, 0)).astype(x_sc.dtype)        # (S, C), tiny
    shift2d = shift.reshape(1, C).astype(jnp.float32)

    Bn, Ct = _choose_global_tiles(N, C, S, x_sc.dtype, channels_on_lanes=True)
    grid = (_cdiv(C, Ct), _cdiv(N, Bn))

    out = pl.pallas_call(
        _gdconv_global_cl_kernel,
        out_shape=jax.ShapeDtypeStruct((N, C), x_sc.dtype),
        grid=grid,
        in_specs=[
            pl.BlockSpec((Bn, S, Ct), lambda c, b: (b, 0, c)),
            pl.BlockSpec((S, Ct), lambda c, b: (0, c)),
            pl.BlockSpec((1, Ct), lambda c, b: (0, c)),
        ],
        out_specs=pl.BlockSpec((Bn, Ct), lambda c, b: (b, c)),
        compiler_params=pltpu.CompilerParams(
            dimension_semantics=("parallel", "parallel"),
            vmem_limit_bytes=32 * 1024 * 1024),
        cost_estimate=_global_cost(N, C, S, x_sc.dtype, w_eff_t.dtype),
    )(x_sc, w_eff_t, shift2d)
    return out                                           # (N, C)


# --------------------------------------------------------------------------- #
# General (non-global) fallback
# --------------------------------------------------------------------------- #
def _gdconv_general(x, weight, scale, shift, *, KH, KW, PH, PW, OH, OW):
    """Fallback for non-global configs (kept simple; not the GDConv hot path)."""
    N, C, H, W = x.shape
    Hp, Wp = H + 2 * PH, W + 2 * PW
    itemsize = jnp.dtype(x.dtype).itemsize

    x_nhwc = jnp.transpose(x, (0, 2, 3, 1))
    if PH > 0 or PW > 0:
        x_nhwc = jnp.pad(x_nhwc, ((0, 0), (PH, PH), (PW, PW), (0, 0)))

    # (C,1,KH,KW) -> (KH*KW, C), BN scale folded in.
    w = jnp.transpose(weight[:, 0, :, :], (1, 2, 0)).reshape(KH * KW, C)
    w = (w.astype(jnp.float32) * scale[None, :]).astype(x.dtype)
    shift2d = shift.reshape(1, C).astype(jnp.float32)

    # [R8] channel-tile the grid so the per-step VMEM footprint stays bounded.
    Ct = C
    if C % 128 == 0:
        while (Ct % 256 == 0 and
               Hp * _round_up(Wp, 8) * _round_up(Ct, 128) * itemsize > (4 << 20)):
            Ct //= 2

    kernel = functools.partial(_gdconv_general_kernel, KH=KH, KW=KW, OH=OH, OW=OW)

    out_nhwc = pl.pallas_call(
        kernel,
        out_shape=jax.ShapeDtypeStruct((N, OH, OW, C), x.dtype),
        grid=(_cdiv(C, Ct), N),                       # [R2] weights constant inner
        in_specs=[
            pl.BlockSpec((1, Hp, Wp, Ct), lambda c, n: (n, 0, 0, c)),
            pl.BlockSpec((KH * KW, Ct), lambda c, n: (0, c)),
            pl.BlockSpec((1, Ct), lambda c, n: (0, c)),
        ],
        out_specs=pl.BlockSpec((1, OH, OW, Ct), lambda c, n: (n, 0, 0, c)),
        scratch_shapes=[pltpu.VMEM((OH, OW, Ct), jnp.float32)],
        compiler_params=pltpu.CompilerParams(
            dimension_semantics=("parallel", "parallel"),
            vmem_limit_bytes=32 * 1024 * 1024),
    )(x_nhwc, w, shift2d)

    return jnp.transpose(out_nhwc, (0, 3, 1, 2))


# --------------------------------------------------------------------------- #
# Public API (mirrors the PyTorch module: depthwise Conv2d + BatchNorm2d)
# --------------------------------------------------------------------------- #
def gdconv(x_nchw, weight, gamma, beta, running_mean, running_var,
           *, kernel_size, padding, eps=1e-5):
    """Depthwise Conv2d(groups=C, bias=False) + BatchNorm2d (eval), NCHW in/out."""
    N, C, H, W = x_nchw.shape
    KH, KW = _normalize_pair(kernel_size)
    PH, PW = _normalize_pair(padding)
    OH = H + 2 * PH - KH + 1
    OW = W + 2 * PW - KW + 1
    assert OH >= 1 and OW >= 1, "kernel larger than (padded) input"

    scale, shift = _fold_bn(gamma, beta, running_mean, running_var, eps)

    if OH == 1 and OW == 1:
        return _gdconv_global_nchw(x_nchw, weight, scale, shift,
                                   KH=KH, KW=KW, PH=PH, PW=PW)
    return _gdconv_general(x_nchw, weight, scale, shift,
                           KH=KH, KW=KW, PH=PH, PW=PW, OH=OH, OW=OW)


def gdconv_channels_last(x_nhwc, weight, gamma, beta, running_mean, running_var,
                         *, kernel_size, padding, eps=1e-5):
    """Channels-last (NHWC) entry point for the global GDConv case  [R1].

    Takes (N, H, W, C) activations, returns (N, 1, 1, C).  With channels on the
    lane axis the spatial reduce is a cheap sublane reduction and the kernel is
    HBM-bound; callers whose activations are already channels-last pay zero
    transposes.
    """
    N, H, W, C = x_nhwc.shape
    KH, KW = _normalize_pair(kernel_size)
    PH, PW = _normalize_pair(padding)
    OH = H + 2 * PH - KH + 1
    OW = W + 2 * PW - KW + 1
    if OH != 1 or OW != 1:
        raise NotImplementedError(
            "gdconv_channels_last only implements the global (1x1-output) case")
    scale, shift = _fold_bn(gamma, beta, running_mean, running_var, eps)
    out = _gdconv_global_cl(x_nhwc.reshape(N, H * W, C), weight, scale, shift,
                            H=H, W=W, PH=PH, PW=PW)
    return out.reshape(N, 1, 1, C)


# --------------------------------------------------------------------------- #
# Reference + self-test
# --------------------------------------------------------------------------- #
def _reference(x, weight, gamma, beta, mean, var, kernel_size, padding, eps):
    C = x.shape[1]
    KH, KW = _normalize_pair(kernel_size)
    PH, PW = _normalize_pair(padding)
    x_nhwc = jnp.transpose(x, (0, 2, 3, 1)).astype(jnp.float32)
    w_hwio = jnp.transpose(weight, (2, 3, 1, 0)).astype(jnp.float32)  # (KH,KW,1,C)
    y = lax.conv_general_dilated(
        x_nhwc, w_hwio, window_strides=(1, 1),
        padding=[(PH, PH), (PW, PW)],
        dimension_numbers=("NHWC", "HWIO", "NHWC"),
        feature_group_count=C,
        precision=lax.Precision.HIGHEST)
    y = (y - mean) / jnp.sqrt(var + eps) * gamma + beta
    return jnp.transpose(y, (0, 3, 1, 2))


def _make_inputs(key, N, C, H, W, kernel_size):
    k1, k2, k3, k4, k5, k6 = jax.random.split(key, 6)
    KH, KW = _normalize_pair(kernel_size)
    x = jax.random.normal(k1, (N, C, H, W), jnp.float32)
    weight = jax.random.normal(k2, (C, 1, KH, KW), jnp.float32) * 0.1
    gamma = 1.0 + 0.1 * jax.random.normal(k3, (C,), jnp.float32)
    beta = 0.1 * jax.random.normal(k4, (C,), jnp.float32)
    mean = 0.1 * jax.random.normal(k5, (C,), jnp.float32)
    var = jax.nn.softplus(jax.random.normal(k6, (C,), jnp.float32)) + 0.5
    return x, weight, gamma, beta, mean, var


def _run_case(key, N, C, H, W, kernel_size, padding, dtype=jnp.float32,
              atol=1e-4, rtol=1e-4, eps=1e-5):
    x, weight, gamma, beta, mean, var = _make_inputs(key, N, C, H, W, kernel_size)
    x = x.astype(dtype)
    out = gdconv(x, weight, gamma, beta, mean, var,
                 kernel_size=kernel_size, padding=padding, eps=eps)
    out = jax.block_until_ready(out)
    ref = _reference(x, weight, gamma, beta, mean, var, kernel_size, padding, eps)
    assert out.shape == ref.shape, (out.shape, ref.shape)
    out32 = out.astype(jnp.float32)
    err = float(jnp.max(jnp.abs(out32 - ref)))
    assert jnp.allclose(out32, ref, atol=atol, rtol=rtol), err


def _run_case_channels_last(key, N, C, H, W, kernel_size, padding,
                            atol=1e-4, rtol=1e-4, eps=1e-5):
    x, weight, gamma, beta, mean, var = _make_inputs(key, N, C, H, W, kernel_size)
    x_nhwc = jnp.transpose(x, (0, 2, 3, 1))
    out = gdconv_channels_last(x_nhwc, weight, gamma, beta, mean, var,
                               kernel_size=kernel_size, padding=padding, eps=eps)
    out = jax.block_until_ready(out)
    ref = _reference(x, weight, gamma, beta, mean, var, kernel_size, padding, eps)
    ref_nhwc = jnp.transpose(ref, (0, 2, 3, 1))
    assert out.shape == ref_nhwc.shape, (out.shape, ref_nhwc.shape)
    err = float(jnp.max(jnp.abs(out - ref_nhwc)))
    assert jnp.allclose(out, ref_nhwc, atol=atol, rtol=rtol), err


if __name__ == "__main__":
    key = jax.random.PRNGKey(0)
    k0, k1, k2, k3, k4, k5 = jax.random.split(key, 6)

    # Canonical GDConv shape class (global 7x7 depthwise): exercises the NCHW
    # fast path with a ragged batch tile (N=10, Bn=8) and a 2-block grid [R5].
    _run_case(k0, N=10, C=128, H=7, W=7, kernel_size=7, padding=0)
    # Tiny global config (C not a multiple of 128, single block).
    _run_case(k1, N=2, C=4, H=8, W=8, kernel_size=8, padding=0)
    # Global conv with padding (padding folded into a weight crop; no jnp.pad).
    _run_case(k2, N=2, C=4, H=6, W=6, kernel_size=8, padding=1)
    # bf16 activations: multiply stays bf16, accumulation in f32 [R6].
    _run_case(k3, N=8, C=128, H=7, W=7, kernel_size=7, padding=0,
              dtype=jnp.bfloat16, atol=5e-2, rtol=5e-2)
    # Channels-last entry point: channels on lanes, sublane spatial reduce [R1].
    _run_case_channels_last(k4, N=3, C=128, H=7, W=7, kernel_size=7, padding=0)
    # Non-global configuration exercises the general fallback kernel [R8].
    _run_case(k5, N=2, C=4, H=8, W=8, kernel_size=3, padding=1)

    print("KERNEL_OK")
</pallas_src>

<mosaic_0001>
module attributes {stable_mosaic.version = 11 : i64} {
  func.func @_gdconv_global_nchw_kernel(%arg0: i32, %arg1: i32, %arg2: memref<8x128x49xf32, #tpu.memory_space<vmem>>, %arg3: memref<128x49xf32, #tpu.memory_space<vmem>>, %arg4: memref<1x128xf32, #tpu.memory_space<vmem>>, %arg5: memref<8x128xf32, #tpu.memory_space<vmem>>) attributes {dimension_semantics = [#tpu.dimension_semantics<parallel>, #tpu.dimension_semantics<parallel>], iteration_bounds = array<i64: 1, 2>, scalar_prefetch = 0 : i64, scratch_operands = 0 : i64, tpu.core_type = #tpu.core_type<tc>, window_params = [{transform_indices = @transform_0, window_bounds = array<i64: 8, 128, 49>}, {transform_indices = @transform_1, window_bounds = array<i64: 128, 49>}, {transform_indices = @transform_2, window_bounds = array<i64: 1, 128>}, {transform_indices = @transform_3, window_bounds = array<i64: 8, 128>}]} {
    %c0 = arith.constant 0 : index
    %c0_0 = arith.constant 0 : index
    %c0_1 = arith.constant 0 : index
    %0 = vector.load %arg2[%c0, %c0_0, %c0_1] : memref<8x128x49xf32, #tpu.memory_space<vmem>>, vector<8x128x49xf32>
    %c0_2 = arith.constant 0 : index
    %c0_3 = arith.constant 0 : index
    %1 = vector.load %arg3[%c0_2, %c0_3] : memref<128x49xf32, #tpu.memory_space<vmem>>, vector<128x49xf32>
    %2 = vector.shape_cast %1 : vector<128x49xf32> to vector<1x128x49xf32>
    %3 = vector.broadcast %2 : vector<1x128x49xf32> to vector<8x128x49xf32>
    %4 = arith.mulf %0, %3 : vector<8x128x49xf32>
    %cst = arith.constant dense<0.000000e+00> : vector<8x128xf32>
    %5 = vector.multi_reduction <add>, %4, %cst [2] : vector<8x128x49xf32> to vector<8x128xf32>
    %c0_4 = arith.constant 0 : index
    %c0_5 = arith.constant 0 : index
    %6 = vector.load %arg4[%c0_4, %c0_5] : memref<1x128xf32, #tpu.memory_space<vmem>>, vector<1x128xf32>
    %7 = vector.broadcast %6 : vector<1x128xf32> to vector<8x128xf32>
    %8 = arith.addf %5, %7 : vector<8x128xf32>
    %c0_6 = arith.constant 0 : index
    %c0_7 = arith.constant 0 : index
    %9 = vector.load %arg5[%c0_6, %c0_7] : memref<8x128xf32, #tpu.memory_space<vmem>>, vector<8x128xf32>
    tpu.vector_store %arg5[%c0_6, %c0_7], %8 {strides = array<i32>} : memref<8x128xf32, #tpu.memory_space<vmem>>, vector<8x128xf32>,
    return
  }
  func.func @transform_0(%arg0: i32, %arg1: i32) -> (i32, i32, i32) {
    %c0_i32 = arith.constant 0 : i32
    %c0_i32_0 = arith.constant 0 : i32
    return %arg1, %arg0, %c0_i32 : i32, i32, i32
  }
  func.func @transform_1(%arg0: i32, %arg1: i32) -> (i32, i32) {
    %c0_i32 = arith.constant 0 : i32
    %c0_i32_0 = arith.constant 0 : i32
    return %arg0, %c0_i32 : i32, i32
  }
  func.func @transform_2(%arg0: i32, %arg1: i32) -> (i32, i32) {
    %c0_i32 = arith.constant 0 : i32
    %c0_i32_0 = arith.constant 0 : i32
    return %c0_i32, %arg0 : i32, i32
  }
  func.func @transform_3(%arg0: i32, %arg1: i32) -> (i32, i32) {
    %c0_i32 = arith.constant 0 : i32
    return %arg1, %arg0 : i32, i32
  }
}

</mosaic_0001>

<bundles_post_ra>
// kernel: tpu_custom_call.1
= control target key start
LH: loop header
LB: loop body
LE: loop exit
PB: predicated region body
PF: predicated region fallthrough
CT: control target
= control target key end

     0   :  { %8 = vsyncpa [#allocation3], 0  ;;  %s4148_s0 = inlined_call_operand.vmem [shape: f32[10,128,49], index: 0, kind: input, shape index: {}]   ;;  %s4149_s1 = inlined_call_operand.vmem [shape: f32[128,49], index: 1, kind: input, shape index: {}]   ;;  %s4150_s2 = inlined_call_operand.vmem [shape: f32[1,128], index: 2, kind: input, shape index: {}]   ;;  %s4151_s3 = inlined_call_operand.hbm [shape: f32[10,128], index: 3, kind: output, shape index: {}]  }
   0x1   :  { %10 = vsyncpa [#allocation3 + $0x1], 0  ;;  %s2627_s12 = smov 0   ;;  %s2629_s13 = smov 0  }
   0x2   :  { %s2631_s14 = smov 0   ;;  %s2633_s15 = smov 0  }
   0x3   :  { %s2635_s16 = smov 0   ;;  %s2637_s17 = smov 0  }
   0x4 LB: > { %s2443_s18 = sadd.s32 4294967295, %s2603_s17   ;;  %s2444_s19 = sadd.s32 4294967294, %s2603_s17   ;;  %s2603_s17 = sphi %s2637_s17, %s16_s17   ;;  %s2599_s16 = sphi %s2635_s16, %s4316_s16   ;;  %s2595_s15 = sphi %s2633_s15, %s4315_s15   ;;  %s2591_s14 = sphi %s2631_s14, %s4314_s14   ;;  %s2587_s13 = sphi %s2629_s13, %s4313_s13   ;;  %s2583_s12 = sphi %s2627_s12, %s4312_s12  }
   0x5   : > { %s25_s20 = sadd.s32 1, %s2599_s16  ;;  %s117_s21 = sadd.s32 1, %s2591_s14 }
   0x6   : > { %p26_p0 = scmp.ge.s32.totalorder %s25_s20, 2  ;;  %p127_p1 = scmp.ne.s32.totalorder %s2591_s14, %s2587_s13 }
   0x7   : > { %p128_p2 = scmp.eq.s32.totalorder %s2443_s18, 1  ;;  %p133_p3 = scmp.ne.s32.totalorder %s2587_s13, %s2583_s12 }
   0x8   : > { %s4318_s20 = smov (%p26_p0, %s25_s20), 0  ;;  %p134_p5 = scmp.eq.s32.totalorder %s2444_s19, 1 }
   0x9   : > { %p2667_p4 = por %p128_p2, %p127_p1  ;;  %s112_s23 = ssub.s32 %s2599_s16, %s4318_s20 }
   0xa   : > { %p2449_p6 = scmp.ge.s32.totalorder %s2603_s17, 1  ;;  %p115_p7 = scmp.eq.s32.totalorder %s112_s23, 0 }
   0xb   : > { %p2674_p8 = por %p134_p5, %p133_p3  ;;  %p192_p9 = scmp.lt.s32.totalorder %s2603_s17, 3 }
   0xc   : > { %s2680_s25 = scalar_select %p115_p7, %s2591_s14, %s117_s21  }
   0xd   : > { %p193_p10 = pnand %p2449_p6, %p192_p9 }
   0xf   : > { %196 = sbr.rel (%p193_p10) target bundleno = 823 (0x337), region = 32 }
  0x14   : > { %s2451_s26 = sshll.u32 %s2595_s15, 3  ;;  %v2686_v0 = vld [vmem:[%s4149_s1 + $0x10] sm:$0xff]  ;;  %v2691_v1 = vld [vmem:[%s4149_s1] sm:$0xff]  ;;  %v2696_v2 = vld [vmem:[%s4149_s1 + $0x18] sm:$0xff]  ;;  %vm537_vm0 = vcmask 400384   ;;  %vm1658_vm1 = vcmask 130112  }
  0x15   : > { %p241_p11 = scmp.lt.s32.totalorder %s2451_s26, 9  ;;  %v2706_v3 = vld [vmem:[%s4149_s1 + $0x8] sm:$0xff]  ;;  %v2726_v15 = vld [vmem:[%s4149_s1 + $0x20] sm:$0xff]  ;;  %v2737_v22 = vld [vmem:[%s4149_s1 + $0x38] sm:$0xff]  ;;  %vm1665_vm2 = vcmask 195712   ;;  %vm1672_vm3 = vcmask 261312  }
  0x16   : > { %v2718_v11 = vld [vmem:[%s4149_s1 + $0x28] sm:$0xff]  ;;  %v2744_v25 = vld [vmem:[%s4149_s1 + $0x30] sm:$0xff]  ;;  %v2760_v33 = vld [vmem:[%s4149_s1 + $0x40] sm:$0xff]  ;;  %vm1679_vm4 = vcmask 326912   ;;  %vm1686_vm5 = vcmask 392512   ;;  %vm1693_vm6 = vcmask 458112  }
  0x17   : > { %s4320_s26 = smov (!%p241_p11, %s2451_s26), 9  ;;  %v2753_v30 = vld [vmem:[%s4149_s1 + $0x48] sm:$0xff]  ;;  %v2769_v38 = vld [vmem:[%s4149_s1 + $0x58] sm:$0xff]  ;;  %v2776_v41 = vld [vmem:[%s4149_s1 + $0x50] sm:$0xff]  ;;  %vm1700_vm7 = vcmask 523712   ;;  %vm1707_vm8 = vcmask 589312  }
  0x18   : > { %s2459_s27 = sshll.u32 %s4320_s26, 7  ;;  %v2785_v46 = vld [vmem:[%s4149_s1 + $0x68] sm:$0xff]  ;;  %v2792_v49 = vld [vmem:[%s4149_s1 + $0x60] sm:$0xff]  ;;  %v2801_v54 = vld [vmem:[%s4149_s1 + $0x78] sm:$0xff]  ;;  %vm1714_vm9 = vcmask 654912   ;;  %vm1721_vm10 = vcmask 720512  }
  0x19   : > { %s2701_s9 = scalar_lea.vmem %s4148_s0, %s2459_s27  ;;  %v2808_v57 = vld [vmem:[%s4149_s1 + $0x70] sm:$0xff]  ;;  %vm1728_vm11 = vcmask 786112   ;;  %vm4154_vm12 = vcmask 851712   ;;  %vm1742_vm13 = vcmask 917312   ;;  %vm1749_vm14 = vcmask 982912   ;;  %s231_s6 = sand.u32 1, %s2587_s13  }
  0x1a   : > { %v267_v4 = vld [vmem:[%s2701_s9 + $0x10] sm:$0xff]  ;;  %v265_v5 = vld [vmem:[%s2701_s9] sm:$0xff]  ;;  %v268_v6 = vld [vmem:[%s2701_s9 + $0x18] sm:$0xff]  ;;  %vm1756_vm15 = vcmask 1048512   ;;  %s4078_s7 = sshll.u32 %s231_s6, 3  ;;  %s2456_s8 = sshll.u32 %s2595_s15, 7 }
  0x1b   : > { %v411_v7 = vmul.f32 %v2686_v0, %v267_v4  ;;  %v409_v8 = vmul.f32 %v2691_v1, %v265_v5  ;;  %v412_v9 = vmul.f32 %v2696_v2, %v268_v6  ;;  %v266_v10 = vld [vmem:[%s2701_s9 + $0x8] sm:$0xff]  ;;  %v269_v14 = vld [vmem:[%s2701_s9 + $0x20] sm:$0xff]  ;;  %v272_v23 = vld [vmem:[%s2701_s9 + $0x38] sm:$0xff]  ;;  %s233_s10 = scalar_lea.vmem [#allocation2], %s4078_s7  ;;  %s4106_s21 = scalar_lea.hbm %s4151_s3, %s2456_s8 }
  0x1c   : > { %v410_v12 = vmul.f32 %v2706_v3, %v266_v10  ;;  %v270_v13 = vld [vmem:[%s2701_s9 + $0x28] sm:$0xff]  ;;  %v413_v21 = vmul.f32 %v2726_v15, %v269_v14  ;;  %v271_v24 = vld [vmem:[%s2701_s9 + $0x30] sm:$0xff]  ;;  %v416_v28 = vmul.f32 %v2737_v22, %v272_v23  ;;  %v273_v32 = vld [vmem:[%s2701_s9 + $0x40] sm:$0xff]  ;;  %s2342_s11 = sshll.u32 %s233_s10, 4  ;;  %s2328_s15 = scalar_lea.sflag [#allocation3], %s231_s6  ;;  %s2343_s11 = int_to_ptr.vmem [resolvable:$true] %s2342_s11 }
  0x1d   : > { %v544_v16 = vsel %vm537_vm0, %v411_v7, 0.0  ;;  %v538_v17 = vsel %vm537_vm0, %v409_v8, 0.0  ;;  %v547_v18 = vsel %vm537_vm0, %v412_v9, 0.0  ;;  %v414_v20 = vmul.f32 %v2718_v11, %v270_v13  ;;  %v274_v31 = vld [vmem:[%s2701_s9 + $0x48] sm:$0xff]  ;;  %v276_v39 = vld [vmem:[%s2701_s9 + $0x58] sm:$0xff]  ;;  %v275_v40 = vld [vmem:[%s2701_s9 + $0x50] sm:$0xff] }
  0x1e   : > { %545 = vadd.xlane.f32.xlu1 %v544_v16  ;;  %539 = vadd.xlane.f32.xlu0 %v538_v17  ;;  %v541_v19 = vsel %vm537_vm0, %v410_v12, 0.0  ;;  %v550_v27 = vsel %vm537_vm0, %v413_v21, 0.0  ;;  %v415_v29 = vmul.f32 %v2744_v25, %v271_v24  ;;  %v559_v34 = vsel %vm537_vm0, %v416_v28, 0.0  ;;  %v278_v47 = vld [vmem:[%s2701_s9 + $0x68] sm:$0xff]  ;;  %v277_v48 = vld [vmem:[%s2701_s9 + $0x60] sm:$0xff]  ;;  %v280_v55 = vld [vmem:[%s2701_s9 + $0x78] sm:$0xff] }
  0x1f   : > { %v553_v26 = vsel %vm537_vm0, %v414_v20, 0.0  ;;  %v418_v36 = vmul.f32 %v2753_v30, %v274_v31  ;;  %v417_v37 = vmul.f32 %v2760_v33, %v273_v32  ;;  %v420_v44 = vmul.f32 %v2769_v38, %v276_v39  ;;  %v279_v56 = vld [vmem:[%s2701_s9 + $0x70] sm:$0xff]  ;;  %v282_v62 = vld [vmem:[%s2701_s9 + $0x88] sm:$0xff]  ;;  %v281_v63 = vld [vmem:[%s2701_s9 + $0x80] sm:$0xff]  ;;  %s2527_s23 = scalar_lea.vmem %s2343_s11, 128  ;;  %s2606_s26 = smov [#allocation2]  }
  0x20   : > { %v556_v35 = vsel %vm537_vm0, %v415_v29, 0.0  ;;  %v419_v45 = vmul.f32 %v2776_v41, %v275_v40  ;;  %v422_v52 = vmul.f32 %v2785_v46, %v278_v47  ;;  %v421_v53 = vmul.f32 %v2792_v49, %v277_v48  ;;  %v284_v8 = vld [vmem:[%s2701_s9 + $0x98] sm:$0xff]  ;;  %v283_v9 = vld [vmem:[%s2701_s9 + $0x90] sm:$0xff]  ;;  %v286_v16 = vld [vmem:[%s2701_s9 + $0xa8] sm:$0xff]  ;;  %p2528_p12 = scmp.ne.s32.totalorder %s2343_s11, %s2527_s23  ;;  %s2531_s27 = sshll.u32 %s2606_s26, 4  ;;  %s2532_s27 = int_to_ptr.vmem [resolvable:$false] %s2531_s27 }
  0x21   : > { %v565_v42 = vsel %vm537_vm0, %v418_v36, 0.0  ;;  %v562_v43 = vsel %vm537_vm0, %v417_v37, 0.0  ;;  %v571_v50 = vsel %vm537_vm0, %v420_v44, 0.0  ;;  %v424_v60 = vmul.f32 %v2801_v54, %v280_v55  ;;  %v285_v17 = vld [vmem:[%s2701_s9 + $0xa0] sm:$0xff]  ;;  %v288_v23 = vld [vmem:[%s2701_s9 + $0xb8] sm:$0xff]  ;;  %v287_v24 = vld [vmem:[%s2701_s9 + $0xb0] sm:$0xff]  ;;  %p2534_p1 = scmp.lt.s32.totalorder %s2343_s11, %s2532_s27 }
  0x22   : > { %548 = vadd.xlane.f32.xlu1 %v547_v18  ;;  %542 = vadd.xlane.f32.xlu0 %v541_v19  ;;  %v568_v51 = vsel %vm537_vm0, %v419_v45, 0.0  ;;  %v577_v58 = vsel %vm537_vm0, %v422_v52, 0.0  ;;  %v574_v59 = vsel %vm537_vm0, %v421_v53, 0.0  ;;  %v423_v61 = vmul.f32 %v2808_v57, %v279_v56  ;;  %v290_v31 = vld [vmem:[%s2701_s9 + $0xc8] sm:$0xff]  ;;  %v289_v32 = vld [vmem:[%s2701_s9 + $0xc0] sm:$0xff]  ;;  %v292_v39 = vld [vmem:[%s2701_s9 + $0xd8] sm:$0xff]  ;;  %p2529_p13 = pnand %p2528_p12, %p2667_p4 }
  0x23   : > { %v583_v4 = vsel %vm537_vm0, %v424_v60, 0.0  ;;  %v426_v6 = vmul.f32 %v2706_v3, %v282_v62  ;;  %v425_v7 = vmul.f32 %v2691_v1, %v281_v63  ;;  %v428_v13 = vmul.f32 %v2696_v2, %v284_v8  ;;  %v291_v40 = vld [vmem:[%s2701_s9 + $0xd0] sm:$0xff]  ;;  %v294_v47 = vld [vmem:[%s2701_s9 + $0xe8] sm:$0xff]  ;;  %v293_v48 = vld [vmem:[%s2701_s9 + $0xe0] sm:$0xff]  ;;  %s2533_s28 = scalar_lea.vmem %s2532_s27, 256 }
  0x24   : > { %v580_v5 = vsel %vm537_vm0, %v423_v61, 0.0  ;;  %v427_v14 = vmul.f32 %v2686_v0, %v283_v9  ;;  %v430_v20 = vmul.f32 %v2718_v11, %v286_v16  ;;  %v429_v21 = vmul.f32 %v2726_v15, %v285_v17  ;;  %v296_v55 = vld [vmem:[%s2701_s9 + $0xf8] sm:$0xff]  ;;  %v295_v56 = vld [vmem:[%s2701_s9 + $0xf0] sm:$0xff]  ;;  %v298_v62 = vld [vmem:[%s2701_s9 + $0x108] sm:$0xff]  ;;  %p2530_p0 = pneg %p2529_p13  ;;  %p2535_p2 = scmp.lt.s32.totalorder %s2533_s28, %s2527_s23 }
  0x25   : > { %v589_v10 = vsel %vm537_vm0, %v426_v6, 0.0  ;;  %v586_v12 = vsel %vm537_vm0, %v425_v7, 0.0  ;;  %v595_v18 = vsel %vm537_vm0, %v428_v13, 0.0  ;;  %v432_v28 = vmul.f32 %v2737_v22, %v288_v23  ;;  %v297_v63 = vld [vmem:[%s2701_s9 + $0x100] sm:$0xff]  ;;  %v300_v8 = vld [vmem:[%s2701_s9 + $0x118] sm:$0xff]  ;;  %v299_v9 = vld [vmem:[%s2701_s9 + $0x110] sm:$0xff] }
  0x26   : > { %554 = vadd.xlane.f32.xlu1 %v553_v26  ;;  %551 = vadd.xlane.f32.xlu0 %v550_v27  ;;  %v592_v19 = vsel %vm537_vm0, %v427_v14, 0.0  ;;  %v601_v26 = vsel %vm537_vm0, %v430_v20, 0.0  ;;  %v598_v27 = vsel %vm537_vm0, %v429_v21, 0.0  ;;  %v431_v29 = vmul.f32 %v2744_v25, %v287_v24  ;;  %v302_v16 = vld [vmem:[%s2701_s9 + $0x128] sm:$0xff]  ;;  %v301_v17 = vld [vmem:[%s2701_s9 + $0x120] sm:$0xff]  ;;  %v304_v23 = vld [vmem:[%s2701_s9 + $0x138] sm:$0xff]  ;;  %p2536_p3 = por %p2535_p2, %p2534_p1 }
  0x27   : > { %v434_v36 = vmul.f32 %v2753_v30, %v290_v31  ;;  %v433_v37 = vmul.f32 %v2760_v33, %v289_v32  ;;  %v436_v44 = vmul.f32 %v2769_v38, %v292_v39  ;;  %v435_v45 = vmul.f32 %v2776_v41, %v291_v40  ;;  %v303_v24 = vld [vmem:[%s2701_s9 + $0x130] sm:$0xff]  ;;  %v306_v31 = vld [vmem:[%s2701_s9 + $0x148] sm:$0xff]  ;;  %v305_v32 = vld [vmem:[%s2701_s9 + $0x140] sm:$0xff] }
  0x28   : > { %v438_v52 = vmul.f32 %v2785_v46, %v294_v47  ;;  %v437_v53 = vmul.f32 %v2792_v49, %v293_v48  ;;  %v440_v60 = vmul.f32 %v2801_v54, %v296_v55  ;;  %v439_v61 = vmul.f32 %v2808_v57, %v295_v56  ;;  %v308_v39 = vld [vmem:[%s2701_s9 + $0x158] sm:$0xff]  ;;  %v307_v40 = vld [vmem:[%s2701_s9 + $0x150] sm:$0xff]  ;;  %v310_v47 = vld [vmem:[%s2701_s9 + $0x168] sm:$0xff]  ;;  %p2537_p5 = pnand %p2536_p3, %p2530_p0 }
  0x29   : > { %v442_v6 = vmul.f32 %v2706_v3, %v298_v62  ;;  %v441_v7 = vmul.f32 %v2691_v1, %v297_v63  ;;  %v444_v13 = vmul.f32 %v2696_v2, %v300_v8  ;;  %v443_v14 = vmul.f32 %v2686_v0, %v299_v9  ;;  %v309_v48 = vld [vmem:[%s2701_s9 + $0x160] sm:$0xff]  ;;  %v312_v55 = vld [vmem:[%s2701_s9 + $0x178] sm:$0xff]  ;;  %v311_v56 = vld [vmem:[%s2701_s9 + $0x170] sm:$0xff] }
  0x2a   : > { %560 = vadd.xlane.f32.xlu1 %v559_v34  ;;  %557 = vadd.xlane.f32.xlu0 %v556_v35  ;;  %v607_v34 = vsel %vm537_vm0, %v432_v28, 0.0  ;;  %v604_v35 = vsel %vm537_vm0, %v431_v29, 0.0  ;;  %v446_v20 = vmul.f32 %v2718_v11, %v302_v16  ;;  %v445_v21 = vmul.f32 %v2726_v15, %v301_v17  ;;  %v314_v62 = vld [vmem:[%s2701_s9 + $0x188] sm:$0xff]  ;;  %v313_v63 = vld [vmem:[%s2701_s9 + $0x180] sm:$0xff]  ;;  %v316_v8 = vld [vmem:[%s2701_s9 + $0x198] sm:$0xff] }
  0x2b   : > { %v448_v28 = vmul.f32 %v2737_v22, %v304_v23  ;;  %v447_v29 = vmul.f32 %v2744_v25, %v303_v24  ;;  %v315_v9 = vld [vmem:[%s2701_s9 + $0x190] sm:$0xff]  ;;  %v318_v16 = vld [vmem:[%s2701_s9 + $0x1a8] sm:$0xff]  ;;  %v317_v17 = vld [vmem:[%s2701_s9 + $0x1a0] sm:$0xff] }
  0x2c   : > { %v320_v23 = vld [vmem:[%s2701_s9 + $0x1b8] sm:$0xff]  ;;  %v319_v24 = vld [vmem:[%s2701_s9 + $0x1b0] sm:$0xff] }
  0x2e   : > { %566 = vadd.xlane.f32.xlu1 %v565_v42  ;;  %563 = vadd.xlane.f32.xlu0 %v562_v43  ;;  %v613_v42 = vsel %vm537_vm0, %v434_v36, 0.0  ;;  %v610_v43 = vsel %vm537_vm0, %v433_v37, 0.0  ;;  %v450_v36 = vmul.f32 %v2753_v30, %v306_v31  ;;  %v449_v37 = vmul.f32 %v2760_v33, %v305_v32  ;;  %v322_v31 = vld [vmem:[%s2701_s9 + $0x1c8] sm:$0xff]  ;;  %v321_v32 = vld [vmem:[%s2701_s9 + $0x1c0] sm:$0xff] }
  0x32   : > { %572 = vadd.xlane.f32.xlu1 %v571_v50  ;;  %569 = vadd.xlane.f32.xlu0 %v568_v51  ;;  %v619_v50 = vsel %vm537_vm0, %v436_v44, 0.0  ;;  %v616_v51 = vsel %vm537_vm0, %v435_v45, 0.0  ;;  %v452_v44 = vmul.f32 %v2769_v38, %v308_v39  ;;  %v451_v45 = vmul.f32 %v2776_v41, %v307_v40  ;;  %v324_v39 = vld [vmem:[%s2701_s9 + $0x1d8] sm:$0xff]  ;;  %v323_v40 = vld [vmem:[%s2701_s9 + $0x1d0] sm:$0xff] }
  0x36   : > { %578 = vadd.xlane.f32.xlu1 %v577_v58  ;;  %575 = vadd.xlane.f32.xlu0 %v574_v59  ;;  %v625_v58 = vsel %vm537_vm0, %v438_v52, 0.0  ;;  %v622_v59 = vsel %vm537_vm0, %v437_v53, 0.0  ;;  %v454_v52 = vmul.f32 %v2785_v46, %v310_v47  ;;  %v453_v53 = vmul.f32 %v2792_v49, %v309_v48  ;;  %v326_v47 = vld [vmem:[%s2701_s9 + $0x1e8] sm:$0xff]  ;;  %v325_v48 = vld [vmem:[%s2701_s9 + $0x1e0] sm:$0xff] }
  0x3a   : > { %584 = vadd.xlane.f32.xlu1 %v583_v4  ;;  %581 = vadd.xlane.f32.xlu0 %v580_v5  ;;  %v631_v4 = vsel %vm537_vm0, %v440_v60, 0.0  ;;  %v628_v5 = vsel %vm537_vm0, %v439_v61, 0.0  ;;  %v456_v60 = vmul.f32 %v2801_v54, %v312_v55  ;;  %v455_v61 = vmul.f32 %v2808_v57, %v311_v56  ;;  %v328_v55 = vld [vmem:[%s2701_s9 + $0x1f8] sm:$0xff]  ;;  %v327_v56 = vld [vmem:[%s2701_s9 + $0x1f0] sm:$0xff] }
  0x3e   : > { %590 = vadd.xlane.f32.xlu1 %v589_v10  ;;  %587 = vadd.xlane.f32.xlu0 %v586_v12  ;;  %v637_v10 = vsel %vm537_vm0, %v442_v6, 0.0  ;;  %v634_v12 = vsel %vm537_vm0, %v441_v7, 0.0  ;;  %v458_v6 = vmul.f32 %v2706_v3, %v314_v62  ;;  %v457_v7 = vmul.f32 %v2691_v1, %v313_v63  ;;  %v330_v62 = vld [vmem:[%s2701_s9 + $0x208] sm:$0xff]  ;;  %v329_v63 = vld [vmem:[%s2701_s9 + $0x200] sm:$0xff] }
  0x42   : > { %596 = vadd.xlane.f32.xlu1 %v595_v18  ;;  %593 = vadd.xlane.f32.xlu0 %v592_v19  ;;  %v643_v18 = vsel %vm537_vm0, %v444_v13, 0.0  ;;  %v640_v19 = vsel %vm537_vm0, %v443_v14, 0.0  ;;  %v460_v13 = vmul.f32 %v2696_v2, %v316_v8  ;;  %v459_v14 = vmul.f32 %v2686_v0, %v315_v9  ;;  %v332_v8 = vld [vmem:[%s2701_s9 + $0x218] sm:$0xff]  ;;  %v331_v9 = vld [vmem:[%s2701_s9 + $0x210] sm:$0xff] }
  0x46   : > { %602 = vadd.xlane.f32.xlu1 %v601_v26  ;;  %599 = vadd.xlane.f32.xlu0 %v598_v27  ;;  %v649_v26 = vsel %vm537_vm0, %v446_v20, 0.0  ;;  %v646_v27 = vsel %vm537_vm0, %v445_v21, 0.0  ;;  %v462_v20 = vmul.f32 %v2718_v11, %v318_v16  ;;  %v461_v21 = vmul.f32 %v2726_v15, %v317_v17  ;;  %v334_v16 = vld [vmem:[%s2701_s9 + $0x228] sm:$0xff]  ;;  %v333_v17 = vld [vmem:[%s2701_s9 + $0x220] sm:$0xff] }
  0x4a   : > { %608 = vadd.xlane.f32.xlu1 %v607_v34  ;;  %605 = vadd.xlane.f32.xlu0 %v604_v35  ;;  %v655_v34 = vsel %vm537_vm0, %v448_v28, 0.0  ;;  %v652_v35 = vsel %vm537_vm0, %v447_v29, 0.0  ;;  %v464_v28 = vmul.f32 %v2737_v22, %v320_v23  ;;  %v463_v29 = vmul.f32 %v2744_v25, %v319_v24  ;;  %v336_v23 = vld [vmem:[%s2701_s9 + $0x238] sm:$0xff]  ;;  %v335_v24 = vld [vmem:[%s2701_s9 + $0x230] sm:$0xff] }
  0x4e   : > { %614 = vadd.xlane.f32.xlu1 %v613_v42  ;;  %611 = vadd.xlane.f32.xlu0 %v610_v43  ;;  %v661_v42 = vsel %vm537_vm0, %v450_v36, 0.0  ;;  %v658_v43 = vsel %vm537_vm0, %v449_v37, 0.0  ;;  %v466_v36 = vmul.f32 %v2753_v30, %v322_v31  ;;  %v465_v37 = vmul.f32 %v2760_v33, %v321_v32  ;;  %v338_v31 = vld [vmem:[%s2701_s9 + $0x248] sm:$0xff]  ;;  %v337_v32 = vld [vmem:[%s2701_s9 + $0x240] sm:$0xff] }
  0x52   : > { %620 = vadd.xlane.f32.xlu1 %v619_v50  ;;  %617 = vadd.xlane.f32.xlu0 %v616_v51  ;;  %v667_v50 = vsel %vm537_vm0, %v452_v44, 0.0  ;;  %v664_v51 = vsel %vm537_vm0, %v451_v45, 0.0  ;;  %v468_v44 = vmul.f32 %v2769_v38, %v324_v39  ;;  %v467_v45 = vmul.f32 %v2776_v41, %v323_v40 }
  0x53   : > { %v482_v39 = vmul.f32 %v2753_v30, %v338_v31  ;;  %v481_v40 = vmul.f32 %v2760_v33, %v337_v32  ;;  %v350_v31 = vld [vmem:[%s2701_s9 + $0x2a8] sm:$0xff]  ;;  %v349_v32 = vld [vmem:[%s2701_s9 + $0x2a0] sm:$0xff] }
  0x56   : > { %626 = vadd.xlane.f32.xlu1 %v625_v58  ;;  %623 = vadd.xlane.f32.xlu0 %v622_v59  ;;  %v673_v58 = vsel %vm537_vm0, %v454_v52, 0.0  ;;  %v670_v59 = vsel %vm537_vm0, %v453_v53, 0.0  ;;  %v470_v52 = vmul.f32 %v2785_v46, %v326_v47  ;;  %v469_v53 = vmul.f32 %v2792_v49, %v325_v48 }
  0x57   : > { %v757_v47 = vsel %vm537_vm0, %v482_v39, 0.0  ;;  %v754_v48 = vsel %vm537_vm0, %v481_v40, 0.0 }
  0x5a   : > { %632 = vadd.xlane.f32.xlu1 %v631_v4  ;;  %629 = vadd.xlane.f32.xlu0 %v628_v5  ;;  %v679_v4 = vsel %vm537_vm0, %v456_v60, 0.0  ;;  %v676_v5 = vsel %vm537_vm0, %v455_v61, 0.0  ;;  %v472_v60 = vmul.f32 %v2801_v54, %v328_v55  ;;  %v471_v61 = vmul.f32 %v2808_v57, %v327_v56 }
  0x5e   : > { %638 = vadd.xlane.f32.xlu1 %v637_v10  ;;  %635 = vadd.xlane.f32.xlu0 %v634_v12  ;;  %v685_v10 = vsel %vm537_vm0, %v458_v6, 0.0  ;;  %v682_v12 = vsel %vm537_vm0, %v457_v7, 0.0  ;;  %v474_v6 = vmul.f32 %v2706_v3, %v330_v62  ;;  %v473_v7 = vmul.f32 %v2691_v1, %v329_v63  ;;  %v344_v62 = vld [vmem:[%s2701_s9 + $0x278] sm:$0xff]  ;;  %v343_v63 = vld [vmem:[%s2701_s9 + $0x270] sm:$0xff] }
  0x62   : > { %644 = vadd.xlane.f32.xlu1 %v643_v18  ;;  %641 = vadd.xlane.f32.xlu0 %v640_v19  ;;  %v691_v18 = vsel %vm537_vm0, %v460_v13, 0.0  ;;  %v688_v19 = vsel %vm537_vm0, %v459_v14, 0.0  ;;  %v476_v13 = vmul.f32 %v2696_v2, %v332_v8  ;;  %v475_v14 = vmul.f32 %v2686_v0, %v331_v9 }
  0x63   : > { %v488_v8 = vmul.f32 %v2801_v54, %v344_v62  ;;  %v487_v9 = vmul.f32 %v2808_v57, %v343_v63 }
  0x66   : > { %650 = vadd.xlane.f32.xlu1 %v649_v26  ;;  %647 = vadd.xlane.f32.xlu0 %v646_v27  ;;  %v697_v26 = vsel %vm537_vm0, %v462_v20, 0.0  ;;  %v694_v27 = vsel %vm537_vm0, %v461_v21, 0.0  ;;  %v478_v20 = vmul.f32 %v2718_v11, %v334_v16  ;;  %v477_v21 = vmul.f32 %v2726_v15, %v333_v17 }
  0x67   : > { %v775_v16 = vsel %vm537_vm0, %v488_v8, 0.0  ;;  %v772_v17 = vsel %vm537_vm0, %v487_v9, 0.0 }
  0x6a   : > { %656 = vadd.xlane.f32.xlu1 %v655_v34  ;;  %653 = vadd.xlane.f32.xlu0 %v652_v35  ;;  %v703_v34 = vsel %vm537_vm0, %v464_v28, 0.0  ;;  %v700_v35 = vsel %vm537_vm0, %v463_v29, 0.0  ;;  %v480_v28 = vmul.f32 %v2737_v22, %v336_v23  ;;  %v479_v29 = vmul.f32 %v2744_v25, %v335_v24 }
  0x6e   : > { %662 = vadd.xlane.f32.xlu1 %v661_v42  ;;  %659 = vadd.xlane.f32.xlu0 %v658_v43  ;;  %v709_v42 = vsel %vm537_vm0, %v466_v36, 0.0  ;;  %v706_v43 = vsel %vm537_vm0, %v465_v37, 0.0  ;;  %v751_v36 = vsel %vm537_vm0, %v480_v28, 0.0  ;;  %v748_v37 = vsel %vm537_vm0, %v479_v29, 0.0 }
  0x72   : > { %668 = vadd.xlane.f32.xlu1 %v667_v50  ;;  %665 = vadd.xlane.f32.xlu0 %v664_v51  ;;  %v715_v50 = vsel %vm537_vm0, %v468_v44, 0.0  ;;  %v712_v51 = vsel %vm537_vm0, %v467_v45, 0.0 }
  0x76   : > { %674 = vadd.xlane.f32.xlu1 %v673_v58  ;;  %671 = vadd.xlane.f32.xlu0 %v670_v59  ;;  %v721_v58 = vsel %vm537_vm0, %v470_v52, 0.0  ;;  %v718_v59 = vsel %vm537_vm0, %v469_v53, 0.0  ;;  %v342_v52 = vld [vmem:[%s2701_s9 + $0x268] sm:$0xff]  ;;  %v341_v53 = vld [vmem:[%s2701_s9 + $0x260] sm:$0xff] }
  0x7a   : > { %680 = vadd.xlane.f32.xlu1 %v679_v4  ;;  %677 = vadd.xlane.f32.xlu0 %v676_v5  ;;  %v727_v4 = vsel %vm537_vm0, %v472_v60, 0.0  ;;  %v724_v5 = vsel %vm537_vm0, %v471_v61, 0.0  ;;  %v486_v60 = vmul.f32 %v2785_v46, %v342_v52  ;;  %v485_v61 = vmul.f32 %v2792_v49, %v341_v53 }
  0x7e   : > { %686 = vadd.xlane.f32.xlu1 %v685_v10  ;;  %683 = vadd.xlane.f32.xlu0 %v682_v12  ;;  %v733_v10 = vsel %vm537_vm0, %v474_v6, 0.0  ;;  %v730_v12 = vsel %vm537_vm0, %v473_v7, 0.0  ;;  %v769_v6 = vsel %vm537_vm0, %v486_v60, 0.0  ;;  %v766_v7 = vsel %vm537_vm0, %v485_v61, 0.0  ;;  %v354_v60 = vld [vmem:[%s2701_s9 + $0x2c8] sm:$0xff]  ;;  %v353_v61 = vld [vmem:[%s2701_s9 + $0x2c0] sm:$0xff] }
  0x7f   : > { %v498_v8 = vmul.f32 %v2753_v30, %v354_v60  ;;  %v497_v9 = vmul.f32 %v2760_v33, %v353_v61  ;;  %v362_v60 = vld [vmem:[%s2701_s9 + $0x308] sm:$0xff]  ;;  %v361_v61 = vld [vmem:[%s2701_s9 + $0x300] sm:$0xff] }
  0x82   : > { %692 = vadd.xlane.f32.xlu1 %v691_v18  ;;  %689 = vadd.xlane.f32.xlu0 %v688_v19  ;;  %v739_v18 = vsel %vm537_vm0, %v476_v13, 0.0  ;;  %v736_v19 = vsel %vm537_vm0, %v475_v14, 0.0 }
  0x86   : > { %698 = vadd.xlane.f32.xlu1 %v697_v26  ;;  %695 = vadd.xlane.f32.xlu0 %v694_v27  ;;  %v745_v26 = vsel %vm537_vm0, %v478_v20, 0.0  ;;  %v742_v27 = vsel %vm537_vm0, %v477_v21, 0.0  ;;  %v348_v20 = vld [vmem:[%s2701_s9 + $0x298] sm:$0xff]  ;;  %v347_v21 = vld [vmem:[%s2701_s9 + $0x290] sm:$0xff] }
  0x87   : > { %v492_v28 = vmul.f32 %v2696_v2, %v348_v20  ;;  %v491_v29 = vmul.f32 %v2686_v0, %v347_v21 }
  0x89   : > { %v787_v39 = vsel %vm537_vm0, %v492_v28, 0.0  ;;  %v784_v40 = vsel %vm537_vm0, %v491_v29, 0.0 }
  0x8a   : > { %704 = vadd.xlane.f32.xlu1 %v703_v34  ;;  %701 = vadd.xlane.f32.xlu0 %v700_v35 }
  0x8e   : > { %710 = vadd.xlane.f32.xlu1 %v709_v42  ;;  %707 = vadd.xlane.f32.xlu0 %v706_v43  ;;  %v340_v42 = vld [vmem:[%s2701_s9 + $0x258] sm:$0xff]  ;;  %v339_v43 = vld [vmem:[%s2701_s9 + $0x250] sm:$0xff] }
  0x92   : > { %716 = vadd.xlane.f32.xlu1 %v715_v50  ;;  %713 = vadd.xlane.f32.xlu0 %v712_v51  ;;  %v484_v50 = vmul.f32 %v2769_v38, %v340_v42  ;;  %v483_v51 = vmul.f32 %v2776_v41, %v339_v43  ;;  %v494_v42 = vmul.f32 %v2718_v11, %v350_v31 }
  0x93   : > { %v493_v43 = vmul.f32 %v2726_v15, %v349_v32 }
  0x94   : > { %v793_v52 = vsel %vm537_vm0, %v494_v42, 0.0  ;;  %v360_v42 = vld [vmem:[%s2701_s9 + $0x2f8] sm:$0xff] }
  0x95   : > { %v790_v53 = vsel %vm537_vm0, %v493_v43, 0.0  ;;  %v359_v43 = vld [vmem:[%s2701_s9 + $0x2f0] sm:$0xff] }
  0x96   : > { %722 = vadd.xlane.f32.xlu1 %v721_v58  ;;  %719 = vadd.xlane.f32.xlu0 %v718_v59  ;;  %v763_v58 = vsel %vm537_vm0, %v484_v50, 0.0  ;;  %v760_v59 = vsel %vm537_vm0, %v483_v51, 0.0 }
  0x9a   : > { %728 = vadd.xlane.f32.xlu1 %v727_v4  ;;  %725 = vadd.xlane.f32.xlu0 %v724_v5 }
  0x9e   : > { %734 = vadd.xlane.f32.xlu1 %v733_v10  ;;  %731 = vadd.xlane.f32.xlu0 %v730_v12  ;;  %v346_v10 = vld [vmem:[%s2701_s9 + $0x288] sm:$0xff]  ;;  %v345_v12 = vld [vmem:[%s2701_s9 + $0x280] sm:$0xff] }
  0xa2   : > { %740 = vadd.xlane.f32.xlu1 %v739_v18  ;;  %737 = vadd.xlane.f32.xlu0 %v736_v19  ;;  %v490_v18 = vmul.f32 %v2706_v3, %v346_v10  ;;  %v489_v19 = vmul.f32 %v2691_v1, %v345_v12  ;;  %v356_v10 = vld [vmem:[%s2701_s9 + $0x2d8] sm:$0xff]  ;;  %v355_v12 = vld [vmem:[%s2701_s9 + $0x2d0] sm:$0xff] }
  0xa3   : > { %v500_v20 = vmul.f32 %v2769_v38, %v356_v10  ;;  %v499_v21 = vmul.f32 %v2776_v41, %v355_v12  ;;  %v506_v10 = vmul.f32 %v2706_v3, %v362_v60  ;;  %v505_v12 = vmul.f32 %v2691_v1, %v361_v61 }
  0xa5   : > { %v811_v31 = vsel %vm537_vm0, %v500_v20, 0.0  ;;  %v808_v32 = vsel %vm537_vm0, %v499_v21, 0.0 }
  0xa6   : > { %746 = vadd.xlane.f32.xlu1 %v745_v26  ;;  %743 = vadd.xlane.f32.xlu0 %v742_v27  ;;  %v781_v26 = vsel %vm537_vm0, %v490_v18, 0.0  ;;  %v778_v27 = vsel %vm537_vm0, %v489_v19, 0.0  ;;  %v805_v18 = vsel %vm537_vm0, %v498_v8, 0.0  ;;  %v802_v19 = vsel %vm537_vm0, %v497_v9, 0.0 }
  0xa7   : > { %v2984_v34 = vpop.xlane.xlu1 %545  ;;  %v2986_v35 = vpop.xlane.xlu0 %539 }
  0xaa   : > { %752 = vadd.xlane.f32.xlu1 %v751_v36  ;;  %749 = vadd.xlane.f32.xlu0 %v748_v37 }
  0xab   : > { %v2994_v44 = vpop.xlane.xlu1 %548  ;;  %v2996_v45 = vpop.xlane.xlu0 %542 }
  0xae   : > { %758 = vadd.xlane.f32.xlu1 %v757_v47  ;;  %755 = vadd.xlane.f32.xlu0 %v754_v48  ;;  %v352_v47 = vld [vmem:[%s2701_s9 + $0x2b8] sm:$0xff]  ;;  %v351_v48 = vld [vmem:[%s2701_s9 + $0x2b0] sm:$0xff] }
  0xaf   : > { %v3004_v55 = vpop.xlane.xlu1 %554  ;;  %v3006_v56 = vpop.xlane.xlu0 %551 }
  0xb2   : > { %764 = vadd.xlane.f32.xlu1 %v763_v58  ;;  %761 = vadd.xlane.f32.xlu0 %v760_v59  ;;  %v496_v58 = vmul.f32 %v2737_v22, %v352_v47  ;;  %v495_v59 = vmul.f32 %v2744_v25, %v351_v48 }
  0xb3   : > { %v3014_v4 = vpop.xlane.xlu1 %560  ;;  %v3016_v5 = vpop.xlane.xlu0 %557 }
  0xb6   : > { %770 = vadd.xlane.f32.xlu1 %v769_v6  ;;  %767 = vadd.xlane.f32.xlu0 %v766_v7  ;;  %v799_v6 = vsel %vm537_vm0, %v496_v58, 0.0  ;;  %v796_v7 = vsel %vm537_vm0, %v495_v59, 0.0  ;;  %v504_v58 = vmul.f32 %v2801_v54, %v360_v42  ;;  %v503_v59 = vmul.f32 %v2808_v57, %v359_v43 }
  0xb7   : > { %v3024_v13 = vpop.xlane.xlu1 %566  ;;  %v3026_v14 = vpop.xlane.xlu0 %563 }
  0xb8   : > { %v823_v8 = vsel %vm537_vm0, %v504_v58, 0.0  ;;  %v820_v9 = vsel %vm537_vm0, %v503_v59, 0.0  ;;  %v368_v59 = vld [vmem:[%s2701_s9 + $0x338] sm:$0xff] }
  0xba   : > { %776 = vadd.xlane.f32.xlu1 %v775_v16  ;;  %773 = vadd.xlane.f32.xlu0 %v772_v17 }
  0xbb   : > { %v3034_v23 = vpop.xlane.xlu1 %572  ;;  %v3036_v24 = vpop.xlane.xlu0 %569 }
  0xbe   : > { %782 = vadd.xlane.f32.xlu1 %v781_v26  ;;  %779 = vadd.xlane.f32.xlu0 %v778_v27  ;;  %v358_v26 = vld [vmem:[%s2701_s9 + $0x2e8] sm:$0xff]  ;;  %v357_v27 = vld [vmem:[%s2701_s9 + $0x2e0] sm:$0xff] }
  0xbf   : > { %v3044_v36 = vpop.xlane.xlu1 %578  ;;  %v3046_v37 = vpop.xlane.xlu0 %575 }
  0xc2   : > { %788 = vadd.xlane.f32.xlu1 %v787_v39  ;;  %785 = vadd.xlane.f32.xlu0 %v784_v40  ;;  %v502_v39 = vmul.f32 %v2785_v46, %v358_v26  ;;  %v501_v40 = vmul.f32 %v2792_v49, %v357_v27  ;;  %v829_v26 = vsel %vm537_vm0, %v506_v10, 0.0  ;;  %v826_v27 = vsel %vm537_vm0, %v505_v12, 0.0  ;;  %v370_v12 = vld [vmem:[%s2701_s9 + $0x348] sm:$0xff] }
  0xc3   : > { %v3054_v50 = vpop.xlane.xlu1 %584  ;;  %v3056_v51 = vpop.xlane.xlu0 %581  ;;  %v512_v10 = vmul.f32 %v2737_v22, %v368_v59  ;;  %v374_v59 = vld [vmem:[%s2701_s9 + $0x368] sm:$0xff] }
  0xc6   : > { %794 = vadd.xlane.f32.xlu1 %v793_v52  ;;  %791 = vadd.xlane.f32.xlu0 %v790_v53  ;;  %v817_v52 = vsel %vm537_vm0, %v502_v39, 0.0  ;;  %v814_v53 = vsel %vm537_vm0, %v501_v40, 0.0  ;;  %v366_v39 = vld [vmem:[%s2701_s9 + $0x328] sm:$0xff]  ;;  %v365_v40 = vld [vmem:[%s2701_s9 + $0x320] sm:$0xff] }
  0xc7   : > { %v3064_v62 = vpop.xlane.xlu1 %590  ;;  %v3066_v63 = vpop.xlane.xlu0 %587  ;;  %v510_v58 = vmul.f32 %v2718_v11, %v366_v39  ;;  %v371_v39 = vld [vmem:[%s2701_s9 + $0x350] sm:$0xff] }
  0xca   : > { %800 = vadd.xlane.f32.xlu1 %v799_v6  ;;  %797 = vadd.xlane.f32.xlu0 %v796_v7 }
  0xcb   : > { %v3074_v16 = vpop.xlane.xlu1 %596  ;;  %v3076_v17 = vpop.xlane.xlu0 %593 }
  0xce   : > { %806 = vadd.xlane.f32.xlu1 %v805_v18  ;;  %803 = vadd.xlane.f32.xlu0 %v802_v19  ;;  %v364_v18 = vld [vmem:[%s2701_s9 + $0x318] sm:$0xff]  ;;  %v363_v19 = vld [vmem:[%s2701_s9 + $0x310] sm:$0xff] }
  0xcf   : > { %v3084_v28 = vpop.xlane.xlu1 %602  ;;  %v3086_v29 = vpop.xlane.xlu0 %599 }
  0xd2   : > { %812 = vadd.xlane.f32.xlu1 %v811_v31  ;;  %809 = vadd.xlane.f32.xlu0 %v808_v32  ;;  %v508_v31 = vmul.f32 %v2696_v2, %v364_v18  ;;  %v507_v32 = vmul.f32 %v2686_v0, %v363_v19  ;;  %v509_v2 = vmul.f32 %v2726_v15, %v365_v40  ;;  %v367_v0 = vld [vmem:[%s2701_s9 + $0x330] sm:$0xff]  ;;  %v369_v15 = vld [vmem:[%s2701_s9 + $0x340] sm:$0xff] }
  0xd3   : > { %v3094_v47 = vpop.xlane.xlu1 %608  ;;  %v3096_v48 = vpop.xlane.xlu0 %605  ;;  %v511_v11 = vmul.f32 %v2744_v25, %v367_v0  ;;  %v513_v22 = vmul.f32 %v2760_v33, %v369_v15  ;;  %v373_v0 = vld [vmem:[%s2701_s9 + $0x360] sm:$0xff]  ;;  %v376_v15 = vld [vmem:[%s2701_s9 + $0x378] sm:$0xff] }
  0xd6   : > { %818 = vadd.xlane.f32.xlu1 %v817_v52  ;;  %815 = vadd.xlane.f32.xlu0 %v814_v53  ;;  %v835_v52 = vsel %vm537_vm0, %v508_v31, 0.0  ;;  %v832_v53 = vsel %vm537_vm0, %v507_v32, 0.0  ;;  %v514_v31 = vmul.f32 %v2753_v30, %v370_v12  ;;  %v372_v32 = vld [vmem:[%s2701_s9 + $0x358] sm:$0xff]  ;;  %v515_v30 = vmul.f32 %v2776_v41, %v371_v39 }
  0xd7   : > { %v3104_v6 = vpop.xlane.xlu1 %614  ;;  %v3106_v7 = vpop.xlane.xlu0 %611  ;;  %v518_v12 = vmul.f32 %v2785_v46, %v374_v59  ;;  %v520_v39 = vmul.f32 %v2801_v54, %v376_v15 }
  0xd9   : > { %v871_v59 = vsel %vm537_vm0, %v520_v39, 0.0 }
  0xda   : > { %824 = vadd.xlane.f32.xlu1 %v823_v8  ;;  %821 = vadd.xlane.f32.xlu0 %v820_v9  ;;  %v841_v8 = vsel %vm537_vm0, %v510_v58, 0.0  ;;  %v838_v9 = vsel %vm537_vm0, %v509_v2, 0.0  ;;  %v850_v58 = vsel %vm537_vm0, %v513_v22, 0.0  ;;  %v516_v2 = vmul.f32 %v2769_v38, %v372_v32 }
  0xdb   : > { %v3114_v20 = vpop.xlane.xlu1 %620  ;;  %v3116_v21 = vpop.xlane.xlu0 %617  ;;  %v517_v38 = vmul.f32 %v2792_v49, %v373_v0  ;;  %v865_v22 = vsel %vm537_vm0, %v518_v12, 0.0  ;;  %v379_v12 = vld [vmem:[%s2701_s9 + $0x390] sm:$0xff] }
  0xdd   : > { %v862_v32 = vsel %vm537_vm0, %v517_v38, 0.0 }
  0xde   : > { %830 = vadd.xlane.f32.xlu1 %v829_v26  ;;  %827 = vadd.xlane.f32.xlu0 %v826_v27  ;;  %v847_v26 = vsel %vm537_vm0, %v512_v10, 0.0  ;;  %v844_v27 = vsel %vm537_vm0, %v511_v11, 0.0  ;;  %v859_v10 = vsel %vm537_vm0, %v516_v2, 0.0  ;;  %v856_v11 = vsel %vm537_vm0, %v515_v30, 0.0 }
  0xdf   : > { %v3124_v42 = vpop.xlane.xlu1 %626  ;;  %v3126_v43 = vpop.xlane.xlu0 %623 }
  0xe2   : > { %836 = vadd.xlane.f32.xlu1 %v835_v52  ;;  %833 = vadd.xlane.f32.xlu0 %v832_v53  ;;  %v853_v53 = vsel %vm537_vm0, %v514_v31, 0.0 }
  0xe3   : > { %v3134_v60 = vpop.xlane.xlu1 %632  ;;  %v3136_v61 = vpop.xlane.xlu0 %629 }
  0xe6   : > { %842 = vadd.xlane.f32.xlu1 %v841_v8  ;;  %839 = vadd.xlane.f32.xlu0 %v838_v9 }
  0xe7   : > { %v3144_v18 = vpop.xlane.xlu1 %638  ;;  %v3146_v19 = vpop.xlane.xlu0 %635 }
  0xea   : > { %848 = vadd.xlane.f32.xlu1 %v847_v26  ;;  %845 = vadd.xlane.f32.xlu0 %v844_v27  ;;  %v375_v26 = vld [vmem:[%s2701_s9 + $0x370] sm:$0xff] }
  0xeb   : > { %v3154_v40 = vpop.xlane.xlu1 %644  ;;  %v3156_v52 = vpop.xlane.xlu0 %641  ;;  %v519_v46 = vmul.f32 %v2808_v57, %v375_v26 }
  0xed   : > { %v868_v0 = vsel %vm537_vm0, %v519_v46, 0.0  ;;  %v382_v46 = vld [vmem:[%s2701_s9 + $0x3a8] sm:$0xff] }
  0xee   : > { %854 = vadd.xlane.f32.xlu1 %v853_v53  ;;  %851 = vadd.xlane.f32.xlu0 %v850_v58  ;;  %v378_v53 = vld [vmem:[%s2701_s9 + $0x388] sm:$0xff]  ;;  %v377_v58 = vld [vmem:[%s2701_s9 + $0x380] sm:$0xff] }
  0xef   : > { %v3164_v8 = vpop.xlane.xlu1 %650  ;;  %v3166_v9 = vpop.xlane.xlu0 %647  ;;  %v521_v54 = vmul.f32 %v2691_v1, %v377_v58  ;;  %v2519_v1 = vld [vmem:[%s4149_s1 + $0x10] sm:$0xff] }
  0xf0   : > { %v523_v39 = vmul.f32 %v2519_v1, %v379_v12  ;;  %v2521_v12 = vld [vmem:[%s4149_s1 + $0x20] sm:$0xff] }
  0xf2   : > { %860 = vadd.xlane.f32.xlu1 %v859_v10  ;;  %857 = vadd.xlane.f32.xlu0 %v856_v11  ;;  %v522_v10 = vmul.f32 %v2706_v3, %v378_v53  ;;  %v380_v11 = vld [vmem:[%s2701_s9 + $0x398] sm:$0xff]  ;;  %v381_v53 = vld [vmem:[%s2701_s9 + $0x3a0] sm:$0xff] }
  0xf3   : > { %v3174_v27 = vpop.xlane.xlu1 %656  ;;  %v3176_v31 = vpop.xlane.xlu0 %653 }
  0xf4   : > { %v877_v26 = vsel %vm537_vm0, %v522_v10, 0.0  ;;  %v880_v10 = vsel %vm537_vm0, %v523_v39, 0.0 }
  0xf6   : > { %866 = vadd.xlane.f32.xlu1 %v865_v22  ;;  %863 = vadd.xlane.f32.xlu0 %v862_v32  ;;  %v874_v22 = vsel %vm537_vm0, %v521_v54, 0.0  ;;  %v2518_v32 = vld [vmem:[%s4149_s1 + $0x18] sm:$0xff]  ;;  %v2520_v54 = vld [vmem:[%s4149_s1 + $0x28] sm:$0xff] }
  0xf7   : > { %v3184_v2 = vpop.xlane.xlu1 %662  ;;  %v3186_v30 = vpop.xlane.xlu0 %659  ;;  %v524_v3 = vmul.f32 %v2518_v32, %v380_v11  ;;  %v526_v11 = vmul.f32 %v2520_v54, %v382_v46  ;;  %v383_v32 = vld [vmem:[%s2701_s9 + $0x3b0] sm:$0xff]  ;;  %v2522_v46 = vld [vmem:[%s4149_s1 + $0x38] sm:$0xff] }
  0xf9   : > { %v889_v39 = vsel %vm537_vm0, %v526_v11, 0.0 }
  0xfa   : > { %872 = vadd.xlane.f32.xlu1 %v871_v59  ;;  %869 = vadd.xlane.f32.xlu0 %v868_v0  ;;  %v883_v0 = vsel %vm537_vm0, %v524_v3, 0.0 }
  0xfb   : > { %v3194_v38 = vpop.xlane.xlu1 %668  ;;  %v3196_v15 = vpop.xlane.xlu0 %665 }
  0xfe   : > { %878 = vadd.xlane.f32.xlu1 %v877_v26  ;;  %875 = vadd.xlane.f32.xlu0 %v874_v22  ;;  %v525_v26 = vmul.f32 %v2521_v12, %v381_v53  ;;  %v384_v22 = vld [vmem:[%s2701_s9 + $0x3b8] sm:$0xff]  ;;  %v527_v53 = vmul.f32 %v2744_v25, %v383_v32  ;;  %v386_v12 = vld [vmem:[%s2701_s9 + $0x3c8] sm:$0xff] }
  0xff   : > { %v3208_v58 = vpop.xlane.xlu1 %674  ;;  %v3210_v59 = vpop.xlane.xlu0 %671  ;;  %v528_v54 = vmul.f32 %v2522_v46, %v384_v22  ;;  %v2523_v22 = vld [vmem:[%s4149_s1 + $0x48] sm:$0xff]  ;;  %v388_v32 = vld [vmem:[%s2701_s9 + $0x3d8] sm:$0xff] }
 0x100   : > { %4157 = vst [vmem:[#allocation5_spill] sm:$0xff] %v3208_v58  ;;  %v886_v58 = vsel %vm537_vm0, %v525_v26, 0.0  ;;  %v892_v26 = vsel %vm537_vm0, %v527_v53, 0.0  ;;  %v530_v46 = vmul.f32 %v2523_v22, %v386_v12  ;;  %v2524_v12 = vld [vmem:[%s4149_s1 + $0x58] sm:$0xff] }
 0x101   : > { %v895_v11 = vsel %vm537_vm0, %v528_v54, 0.0  ;;  %v532_v22 = vmul.f32 %v2524_v12, %v388_v32 }
 0x102   : > { %884 = vadd.xlane.f32.xlu1 %v883_v0  ;;  %881 = vadd.xlane.f32.xlu0 %v880_v10  ;;  %v385_v0 = vld [vmem:[%s2701_s9 + $0x3c0] sm:$0xff]  ;;  %v901_v54 = vsel %vm537_vm0, %v530_v46, 0.0 }
 0x103   : > { %v3222_v1 = vpop.xlane.xlu1 %680  ;;  %v3224_v3 = vpop.xlane.xlu0 %677  ;;  %v529_v25 = vmul.f32 %v2760_v33, %v385_v0  ;;  %v390_v0 = vld [vmem:[%s2701_s9 + $0x3e8] sm:$0xff]  ;;  %v907_v46 = vsel %vm537_vm0, %v532_v22, 0.0 }
 0x104   : > { %4158 = vst [vmem:[#allocation6_spill] sm:$0xff] %v3222_v1 }
 0x105   : > { %v898_v53 = vsel %vm537_vm0, %v529_v25, 0.0 }
 0x106   : > { %890 = vadd.xlane.f32.xlu1 %v889_v39  ;;  %887 = vadd.xlane.f32.xlu0 %v886_v58  ;;  %v387_v39 = vld [vmem:[%s2701_s9 + $0x3d0] sm:$0xff] }
 0x107   : > { %v3234_v10 = vpop.xlane.xlu1 %686  ;;  %v3236_v1 = vpop.xlane.xlu0 %683  ;;  %v531_v33 = vmul.f32 %v2776_v41, %v387_v39  ;;  %v392_v41 = vld [vmem:[%s2701_s9 + $0x3f8] sm:$0xff]  ;;  %v391_v39 = vld [vmem:[%s2701_s9 + $0x3f0] sm:$0xff] }
 0x108   : > { %4159 = vst [vmem:[#allocation7_spill] sm:$0xff] %v3234_v10  ;;  %4160 = vst [vmem:[#allocation8_spill] sm:$0xff] %v3236_v1 }
 0x109   : > { %v904_v25 = vsel %vm537_vm0, %v531_v33, 0.0  ;;  %v2526_v33 = vld [vmem:[%s4149_s1 + $0x78] sm:$0xff] }
 0x10a   : > { %896 = vadd.xlane.f32.xlu1 %v895_v11  ;;  %893 = vadd.xlane.f32.xlu0 %v892_v26  ;;  %v389_v11 = vld [vmem:[%s2701_s9 + $0x3e0] sm:$0xff] }
 0x10b   : > { %v3246_v58 = vpop.xlane.xlu1 %692  ;;  %v3248_v10 = vpop.xlane.xlu0 %689  ;;  %v533_v32 = vmul.f32 %v2792_v49, %v389_v11 }
 0x10c   : > { %4161 = vst [vmem:[#allocation9_spill] sm:$0xff] %v3246_v58  ;;  %4162 = vst [vmem:[#allocation10_spill] sm:$0xff] %v3248_v10  ;;  %v2525_v10 = vld [vmem:[%s4149_s1 + $0x68] sm:$0xff] }
 0x10d   : > { %v534_v1 = vmul.f32 %v2525_v10, %v390_v0  ;;  %v910_v22 = vsel %vm537_vm0, %v533_v32, 0.0  ;;  %v535_v10 = vmul.f32 %v2808_v57, %v391_v39 }
 0x10e   : > { %902 = vadd.xlane.f32.xlu1 %v901_v54  ;;  %899 = vadd.xlane.f32.xlu0 %v898_v53 }
 0x10f   : > { %v3258_v26 = vpop.xlane.xlu1 %698  ;;  %v3260_v58 = vpop.xlane.xlu0 %695  ;;  %v913_v12 = vsel %vm537_vm0, %v534_v1, 0.0 }
 0x110   : > { %4163 = vst [vmem:[#allocation11_spill] sm:$0xff] %v3258_v26  ;;  %v536_v26 = vmul.f32 %v2526_v33, %v392_v41  ;;  %v2605_v33 = vmov 0  }
 0x111   : > { %2517 = vset.pattern.permute.xlu1 %v2605_v33  ;;  %2516 = vset.pattern.permute.xlu0 %v2605_v33 }
 0x112   : > { %908 = vadd.xlane.f32.xlu1 %v907_v46  ;;  %905 = vadd.xlane.f32.xlu0 %v904_v25  ;;  %v919_v11 = vsel %vm537_vm0, %v536_v26, 0.0  ;;  %v916_v46 = vsel %vm537_vm0, %v535_v10, 0.0  ;;  %v2454_v26 = vld [vmem:[%s4150_s2] ss:$0 sm:$0xff]  ;;  %vm2311_vm0 = vcmask 1041409  }
 0x113   : > { %v3270_v54 = vpop.xlane.xlu1 %704  ;;  %v3272_v53 = vpop.xlane.xlu0 %701 }
 0x116   : > { %914 = vadd.xlane.f32.xlu1 %v913_v12  ;;  %911 = vadd.xlane.f32.xlu0 %v910_v22 }
 0x117   : > { %v3280_v49 = vpop.xlane.xlu1 %710  ;;  %v3282_v0 = vpop.xlane.xlu0 %707 }
 0x11a   : > { %920 = vadd.xlane.f32.xlu1 %v919_v11  ;;  %917 = vadd.xlane.f32.xlu0 %v916_v46 }
 0x11b   : > { %v3286_v1 = vpop.xlane.xlu1 %716  ;;  %v3288_v25 = vpop.xlane.xlu0 %713 }
 0x11f   : > { %v3290_v32 = vpop.xlane.xlu1 %722  ;;  %v3292_v41 = vpop.xlane.xlu0 %719 }
 0x120   : > { %4164 = vst [vmem:[#allocation12_spill] sm:$0xff] %v3290_v32  ;;  %4165 = vst [vmem:[#allocation13_spill] sm:$0xff] %v3292_v41 }
 0x123   : > { %v3294_v57 = vpop.xlane.xlu1 %728  ;;  %v3296_v39 = vpop.xlane.xlu0 %725 }
 0x124   : > { %4166 = vst [vmem:[#allocation14_spill] sm:$0xff] %v3294_v57  ;;  %4167 = vst [vmem:[#allocation15_spill] sm:$0xff] %v3296_v39 }
 0x127   : > { %v3298_v12 = vpop.xlane.xlu1 %734  ;;  %v3300_v22 = vpop.xlane.xlu0 %731 }
 0x128   : > { %4168 = vst [vmem:[#allocation16_spill] sm:$0xff] %v3298_v12  ;;  %4169 = vst [vmem:[#allocation17_spill] sm:$0xff] %v3300_v22 }
 0x12b   : > { %v3305_v10 = vpop.xlane.xlu1 %740  ;;  %v3307_v11 = vpop.xlane.xlu0 %737  ;;  %933 = vbcast.lane.b32.xlu1 %v2454_v26, 264 }
 0x12c   : > { %4170 = vst [vmem:[#allocation18_spill] sm:$0xff] %v3305_v10  ;;  %4171 = vst [vmem:[#allocation19_spill] sm:$0xff] %v3307_v11 }
 0x12f   : > { %v3309_v46 = vpop.xlane.xlu1 %746  ;;  %v3311_v57 = vpop.xlane.xlu0 %743  ;;  %937 = vbcast.lane.b32.xlu1 %v2454_v26, 272 }
 0x130   : > { %4172 = vst [vmem:[#allocation20_spill] sm:$0xff] %v3309_v46  ;;  %4173 = vst [vmem:[#allocation21_spill] sm:$0xff] %v3311_v57  ;;  %929 = vbcast.lane.b32.xlu0 %v2454_v26, 256 }
 0x133   : > { %v3313_v12 = vpop.xlane.xlu1 %752  ;;  %v3315_v22 = vpop.xlane.xlu0 %749  ;;  %941 = vbcast.lane.b32.xlu1 %v2454_v26, 280 }
 0x134   : > { %4174 = vst [vmem:[#allocation22_spill] sm:$0xff] %v3313_v12  ;;  %4175 = vst [vmem:[#allocation23_spill] sm:$0xff] %v3315_v22  ;;  %945 = vbcast.lane.b32.xlu0 %v2454_v26, 288 }
 0x137   : > { %v3317_v39 = vpop.xlane.xlu1 %758  ;;  %v3319_v33 = vpop.xlane.xlu0 %755  ;;  %949 = vbcast.lane.b32.xlu1 %v2454_v26, 296 }
 0x138   : > { %4176 = vst [vmem:[#allocation24_spill] sm:$0xff] %v3317_v39  ;;  %4177 = vst [vmem:[#allocation25_spill] sm:$0xff] %v3319_v33  ;;  %953 = vbcast.lane.b32.xlu0 %v2454_v26, 304 }
 0x13b   : > { %v3321_v10 = vpop.xlane.xlu1 %764  ;;  %v3323_v11 = vpop.xlane.xlu0 %761  ;;  %957 = vbcast.lane.b32.xlu1 %v2454_v26, 312 }
 0x13c   : > { %4178 = vst [vmem:[#allocation26_spill] sm:$0xff] %v3321_v10  ;;  %4179 = vst [vmem:[#allocation27_spill] sm:$0xff] %v3323_v11  ;;  %961 = vbcast.lane.b32.xlu0 %v2454_v26, 320 }
 0x13f   : > { %v3325_v46 = vpop.xlane.xlu1 %770  ;;  %v3327_v57 = vpop.xlane.xlu0 %767  ;;  %965 = vbcast.lane.b32.xlu1 %v2454_v26, 328 }
 0x140   : > { %4180 = vst [vmem:[#allocation28_spill] sm:$0xff] %v3325_v46  ;;  %4181 = vst [vmem:[#allocation29_spill] sm:$0xff] %v3327_v57  ;;  %969 = vbcast.lane.b32.xlu0 %v2454_v26, 336 }
 0x143   : > { %v3329_v12 = vpop.xlane.xlu1 %776  ;;  %v3331_v22 = vpop.xlane.xlu0 %773  ;;  %973 = vbcast.lane.b32.xlu1 %v2454_v26, 344 }
 0x144   : > { %4182 = vst [vmem:[#allocation30_spill] sm:$0xff] %v3329_v12  ;;  %4183 = vst [vmem:[#allocation31_spill] sm:$0xff] %v3331_v22  ;;  %977 = vbcast.lane.b32.xlu0 %v2454_v26, 352 }
 0x147   : > { %v3333_v39 = vpop.xlane.xlu1 %782  ;;  %v3335_v33 = vpop.xlane.xlu0 %779  ;;  %981 = vbcast.lane.b32.xlu1 %v2454_v26, 360 }
 0x148   : > { %4184 = vst [vmem:[#allocation32_spill] sm:$0xff] %v3333_v39  ;;  %4185 = vst [vmem:[#allocation33_spill] sm:$0xff] %v3335_v33  ;;  %985 = vbcast.lane.b32.xlu0 %v2454_v26, 368 }
 0x14b   : > { %v3337_v10 = vpop.xlane.xlu1 %788  ;;  %v3339_v11 = vpop.xlane.xlu0 %785  ;;  %989 = vbcast.lane.b32.xlu1 %v2454_v26, 376 }
 0x14c   : > { %4186 = vst [vmem:[#allocation34_spill] sm:$0xff] %v3337_v10  ;;  %4187 = vst [vmem:[#allocation35_spill] sm:$0xff] %v3339_v11 }
 0x14f   : > { %v3341_v46 = vpop.xlane.xlu1 %794  ;;  %v3343_v57 = vpop.xlane.xlu0 %791 }
 0x150   : > { %4188 = vst [vmem:[#allocation36_spill] sm:$0xff] %v3341_v46  ;;  %4189 = vst [vmem:[#allocation37_spill] sm:$0xff] %v3343_v57 }
 0x153   : > { %v3345_v12 = vpop.xlane.xlu1 %800  ;;  %v3347_v22 = vpop.xlane.xlu0 %797 }
 0x154   : > { %4190 = vst [vmem:[#allocation38_spill] sm:$0xff] %v3345_v12  ;;  %4191 = vst [vmem:[#allocation39_spill] sm:$0xff] %v3347_v22 }
 0x157   : > { %v3349_v32 = vpop.xlane.xlu1 %806  ;;  %v3351_v39 = vpop.xlane.xlu0 %803 }
 0x158   : > { %4192 = vst [vmem:[#allocation40_spill] sm:$0xff] %v3349_v32  ;;  %4193 = vst [vmem:[#allocation41_spill] sm:$0xff] %v3351_v39 }
 0x15b   : > { %v3353_v33 = vpop.xlane.xlu1 %812  ;;  %v3355_v41 = vpop.xlane.xlu0 %809 }
 0x15c   : > { %4194 = vst [vmem:[#allocation42_spill] sm:$0xff] %v3353_v33  ;;  %4195 = vst [vmem:[#allocation43_spill] sm:$0xff] %v3355_v41 }
 0x15f   : > { %v3357_v10 = vpop.xlane.xlu1 %818  ;;  %v3359_v11 = vpop.xlane.xlu0 %815 }
 0x160   : > { %4196 = vst [vmem:[#allocation44_spill] sm:$0xff] %v3357_v10  ;;  %4197 = vst [vmem:[#allocation45_spill] sm:$0xff] %v3359_v11 }
 0x163   : > { %v3361_v26 = vpop.xlane.xlu1 %824  ;;  %v3363_v46 = vpop.xlane.xlu0 %821 }
 0x164   : > { %4198 = vst [vmem:[#allocation46_spill] sm:$0xff] %v3361_v26  ;;  %4199 = vst [vmem:[#allocation47_spill] sm:$0xff] %v3363_v46 }
 0x167   : > { %v3365_v57 = vpop.xlane.xlu1 %830  ;;  %v3367_v12 = vpop.xlane.xlu0 %827 }
 0x168   : > { %4200 = vst [vmem:[#allocation48_spill] sm:$0xff] %v3365_v57  ;;  %4201 = vst [vmem:[#allocation49_spill] sm:$0xff] %v3367_v12 }
 0x16b   : > { %v3369_v22 = vpop.xlane.xlu1 %836  ;;  %v3371_v32 = vpop.xlane.xlu0 %833 }
 0x16c   : > { %4202 = vst [vmem:[#allocation50_spill] sm:$0xff] %v3369_v22  ;;  %4203 = vst [vmem:[#allocation51_spill] sm:$0xff] %v3371_v32 }
 0x16f   : > { %v3373_v39 = vpop.xlane.xlu1 %842  ;;  %v3375_v33 = vpop.xlane.xlu0 %839 }
 0x170   : > { %4204 = vst [vmem:[#allocation52_spill] sm:$0xff] %v3373_v39  ;;  %4205 = vst [vmem:[#allocation53_spill] sm:$0xff] %v3375_v33 }
 0x173   : > { %v3377_v41 = vpop.xlane.xlu1 %848  ;;  %v3379_v10 = vpop.xlane.xlu0 %845 }
 0x174   : > { %4206 = vst [vmem:[#allocation54_spill] sm:$0xff] %v3377_v41  ;;  %4207 = vst [vmem:[#allocation55_spill] sm:$0xff] %v3379_v10 }
 0x177   : > { %v3381_v11 = vpop.xlane.xlu1 %854  ;;  %v3383_v26 = vpop.xlane.xlu0 %851 }
 0x178   : > { %4208 = vst [vmem:[#allocation56_spill] sm:$0xff] %v3381_v11  ;;  %4209 = vst [vmem:[#allocation57_spill] sm:$0xff] %v3383_v26 }
 0x17b   : > { %v3385_v46 = vpop.xlane.xlu1 %860  ;;  %v3387_v57 = vpop.xlane.xlu0 %857 }
 0x17c   : > { %4210 = vst [vmem:[#allocation58_spill] sm:$0xff] %v3385_v46  ;;  %4211 = vst [vmem:[#allocation59_spill] sm:$0xff] %v3387_v57 }
 0x17f   : > { %v3389_v12 = vpop.xlane.xlu1 %866  ;;  %v3391_v22 = vpop.xlane.xlu0 %863 }
 0x180   : > { %4212 = vst [vmem:[#allocation60_spill] sm:$0xff] %v3389_v12  ;;  %4213 = vst [vmem:[#allocation61_spill] sm:$0xff] %v3391_v22 }
 0x183   : > { %v3393_v32 = vpop.xlane.xlu1 %872  ;;  %v3395_v39 = vpop.xlane.xlu0 %869 }
 0x184   : > { %4214 = vst [vmem:[#allocation62_spill] sm:$0xff] %v3393_v32  ;;  %4215 = vst [vmem:[#allocation63_spill] sm:$0xff] %v3395_v39 }
 0x187   : > { %v3397_v33 = vpop.xlane.xlu1 %878  ;;  %v3399_v41 = vpop.xlane.xlu0 %875 }
 0x188   : > { %4216 = vst [vmem:[#allocation64_spill] sm:$0xff] %v3397_v33  ;;  %4217 = vst [vmem:[#allocation65_spill] sm:$0xff] %v3399_v41 }
 0x18b   : > { %v3401_v10 = vpop.xlane.xlu1 %884  ;;  %v3403_v11 = vpop.xlane.xlu0 %881 }
 0x18c   : > { %4218 = vst [vmem:[#allocation66_spill] sm:$0xff] %v3401_v10  ;;  %4219 = vst [vmem:[#allocation67_spill] sm:$0xff] %v3403_v11 }
 0x18f   : > { %v3405_v26 = vpop.xlane.xlu1 %890  ;;  %v3407_v46 = vpop.xlane.xlu0 %887 }
 0x190   : > { %4220 = vst [vmem:[#allocation68_spill] sm:$0xff] %v3405_v26  ;;  %4221 = vst [vmem:[#allocation69_spill] sm:$0xff] %v3407_v46 }
 0x193   : > { %v3409_v57 = vpop.xlane.xlu1 %896  ;;  %v3411_v12 = vpop.xlane.xlu0 %893 }
 0x194   : > { %4222 = vst [vmem:[#allocation70_spill] sm:$0xff] %v3409_v57  ;;  %4223 = vst [vmem:[#allocation71_spill] sm:$0xff] %v3411_v12  ;;  %v4272_v12 = vld [vmem:[#allocation45_spill] sm:$0xff] }
 0x197   : > { %v3413_v22 = vpop.xlane.xlu1 %902  ;;  %v3415_v32 = vpop.xlane.xlu0 %899 }
 0x198   : > { %4224 = vst [vmem:[#allocation72_spill] sm:$0xff] %v3413_v22  ;;  %4225 = vst [vmem:[#allocation73_spill] sm:$0xff] %v3415_v32 }
 0x19b   : > { %v3417_v39 = vpop.xlane.xlu1 %908  ;;  %v3419_v33 = vpop.xlane.xlu0 %905 }
 0x19c   : > { %4226 = vst [vmem:[#allocation74_spill] sm:$0xff] %v3417_v39  ;;  %4227 = vst [vmem:[#allocation75_spill] sm:$0xff] %v3419_v33 }
 0x19f   : > { %v3421_v41 = vpop.xlane.xlu1 %914  ;;  %v3423_v10 = vpop.xlane.xlu0 %911 }
 0x1a0   : > { %4228 = vst [vmem:[#allocation76_spill] sm:$0xff] %v3421_v41  ;;  %4229 = vst [vmem:[#allocation77_spill] sm:$0xff] %v3423_v10 }
 0x1a3   : > { %v3425_v11 = vpop.xlane.xlu1 %920  ;;  %v3427_v26 = vpop.xlane.xlu0 %917 }
 0x1a4   : > { %4230 = vst [vmem:[#allocation78_spill] sm:$0xff] %v3425_v11  ;;  %4231 = vst [vmem:[#allocation79_spill] sm:$0xff] %v3427_v26 }
 0x1a7   : > { %v3429_v46 = vpop.permute.xlu1 %933  ;;  %v3431_v57 = vpop.permute.xlu0 %929 }
 0x1a8   : > { %v1008_v22 = vadd.f32 %v3429_v46, %v2996_v45  ;;  %v1007_v39 = vadd.f32 %v3431_v57, %v2986_v35 }
 0x1aa   : > { %1267 = vperm.xlu1 %2517, %v1008_v22   ;;  %1264 = vperm.xlu0 %2516, %v1007_v39  }
 0x1ab   : > { %v3437_v33 = vpop.permute.xlu1 %937  ;;  %v3439_v41 = vpop.permute.xlu0 %945 }
 0x1ac   : > { %v1009_v11 = vadd.f32 %v3437_v33, %v2984_v34  ;;  %v1011_v35 = vadd.f32 %v3439_v41, %v3006_v56 }
 0x1ae   : > { %1270 = vperm.xlu1 %2517, %v1009_v11  }
 0x1af   : > { %v3443_v26 = vpop.permute.xlu1 %941  ;;  %v3445_v10 = vpop.permute.xlu0 %953 }
 0x1b0   : > { %v1010_v45 = vadd.f32 %v3443_v26, %v2994_v44  ;;  %v1013_v11 = vadd.f32 %v3445_v10, %v3016_v5 }
 0x1b2   : > { %1273 = vperm.xlu0 %2516, %v1010_v45   ;;  %1276 = vperm.xlu1 %2517, %v1011_v35  }
 0x1b3   : > { %v3451_v39 = vpop.permute.xlu1 %949  ;;  %v3453_v22 = vpop.permute.xlu0 %961 }
 0x1b4   : > { %v1012_v34 = vadd.f32 %v3451_v39, %v3004_v55  ;;  %v1015_v45 = vadd.f32 %v3453_v22, %v3026_v14 }
 0x1b6   : > { %1279 = vperm.xlu0 %2516, %v1012_v34   ;;  %1282 = vperm.xlu1 %2517, %v1013_v11  }
 0x1b7   : > { %v3459_v32 = vpop.permute.xlu1 %957  ;;  %v3461_v44 = vpop.permute.xlu0 %969 }
 0x1b8   : > { %v1014_v56 = vadd.f32 %v3459_v32, %v3014_v4  ;;  %v1017_v34 = vadd.f32 %v3461_v44, %v3036_v24 }
 0x1ba   : > { %1285 = vperm.xlu0 %2516, %v1014_v56   ;;  %1288 = vperm.xlu1 %2517, %v1015_v45  }
 0x1bb   : > { %v3467_v35 = vpop.permute.xlu1 %965  ;;  %v3469_v55 = vpop.permute.xlu0 %977 }
 0x1bc   : > { %4232 = vst [vmem:[#allocation80_spill] sm:$0xff] %v3469_v55  ;;  %v1016_v5 = vadd.f32 %v3467_v35, %v3024_v13  ;;  %v1019_v14 = vadd.f32 %v3469_v55, %v3046_v37  ;;  %v1023_v37 = vadd.f32 %v3431_v57, %v3066_v63  ;;  %v1029_v63 = vadd.f32 %v3445_v10, %v3096_v48 }
 0x1bd   : > { %v1035_v48 = vadd.f32 %v3469_v55, %v3126_v43  ;;  %v1041_v43 = vadd.f32 %v3437_v33, %v3156_v52  ;;  %v1047_v52 = vadd.f32 %v3453_v22, %v3186_v30 }
 0x1be   : > { %1291 = vperm.xlu0 %2516, %v1016_v5   ;;  %1294 = vperm.xlu1 %2517, %v1017_v34   ;;  %v1024_v34 = vadd.f32 %v3429_v46, %v3064_v62  ;;  %v1030_v62 = vadd.f32 %v3459_v32, %v3094_v47 }
 0x1bf   : > { %v3475_v11 = vpop.permute.xlu1 %973  ;;  %v3481_v56 = vpop.permute.xlu0 %985 }
 0x1c0   : > { %v1018_v4 = vadd.f32 %v3475_v11, %v3034_v23  ;;  %v1021_v24 = vadd.f32 %v3481_v56, %v3056_v51  ;;  %v1026_v51 = vadd.f32 %v3443_v26, %v3074_v16  ;;  %v1032_v16 = vadd.f32 %v3467_v35, %v3104_v6 }
 0x1c2   : > { %1297 = vperm.xlu0 %2516, %v1018_v4   ;;  %1300 = vperm.xlu1 %2517, %v1019_v14   ;;  %v1027_v4 = vadd.f32 %v3439_v41, %v3086_v29  ;;  %v1033_v29 = vadd.f32 %v3461_v44, %v3116_v21  ;;  %v1039_v21 = vadd.f32 %v3431_v57, %v3146_v19 }
 0x1c3   : > { %v3483_v45 = vpop.permute.xlu1 %981  ;;  %v1045_v19 = vadd.f32 %v3445_v10, %v3176_v31  ;;  %v1051_v31 = vadd.f32 %v3469_v55, %v3210_v59  ;;  %v1053_v14 = vadd.f32 %v3481_v56, %v3224_v3 }
 0x1c4   : > { %v1020_v13 = vadd.f32 %v3483_v45, %v3044_v36  ;;  %v1025_v36 = vadd.f32 %v3437_v33, %v3076_v17  ;;  %v1031_v17 = vadd.f32 %v3453_v22, %v3106_v7  ;;  %v1036_v47 = vadd.f32 %v3483_v45, %v3124_v42 }
 0x1c5   : > { %v1037_v7 = vadd.f32 %v3481_v56, %v3136_v61  ;;  %v1042_v42 = vadd.f32 %v3443_v26, %v3154_v40  ;;  %v1043_v61 = vadd.f32 %v3439_v41, %v3166_v9  ;;  %v1048_v40 = vadd.f32 %v3467_v35, %v3184_v2  ;;  %v4234_v2 = vld [vmem:[#allocation6_spill] sm:$0xff] }
 0x1c6   : > { %1303 = vperm.xlu0 %2516, %v1020_v13   ;;  %1306 = vperm.xlu1 %2517, %v1021_v24   ;;  %v1049_v9 = vadd.f32 %v3461_v44, %v3196_v15  ;;  %v4235_v13 = vld [vmem:[#allocation8_spill] sm:$0xff] }
 0x1c7   : > { %v3489_v5 = vpop.permute.xlu1 %989  ;;  %v1055_v24 = vadd.f32 %v3431_v57, %v4235_v13 }
 0x1c8   : > { %v1022_v23 = vadd.f32 %v3489_v5, %v3054_v50  ;;  %v1028_v50 = vadd.f32 %v3451_v39, %v3084_v28  ;;  %v1034_v28 = vadd.f32 %v3475_v11, %v3114_v20  ;;  %v1038_v6 = vadd.f32 %v3489_v5, %v3134_v60 }
 0x1c9   : > { %v1040_v20 = vadd.f32 %v3429_v46, %v3144_v18  ;;  %v1044_v60 = vadd.f32 %v3451_v39, %v3164_v8  ;;  %v1046_v18 = vadd.f32 %v3459_v32, %v3174_v27  ;;  %v1050_v8 = vadd.f32 %v3475_v11, %v3194_v38  ;;  %v4233_v27 = vld [vmem:[#allocation5_spill] sm:$0xff]  ;;  %v4236_v38 = vld [vmem:[#allocation7_spill] sm:$0xff] }
 0x1ca   : > { %1309 = vperm.xlu0 %2516, %v1022_v23   ;;  %1312 = vperm.xlu1 %2517, %v1023_v37   ;;  %v1052_v30 = vadd.f32 %v3483_v45, %v4233_v27  ;;  %v1054_v15 = vadd.f32 %v3489_v5, %v4234_v2  ;;  %v1056_v59 = vadd.f32 %v3429_v46, %v4236_v38  ;;  %v4237_v23 = vld [vmem:[#allocation10_spill] sm:$0xff]  ;;  %v4249_v27 = vld [vmem:[#allocation20_spill] sm:$0xff] }
 0x1cb   : > { %v1057_v37 = vadd.f32 %v3437_v33, %v4237_v23 }
 0x1ce   : > { %1315 = vperm.xlu0 %2516, %v1024_v34   ;;  %1318 = vperm.xlu1 %2517, %v1025_v36   ;;  %v4238_v34 = vld [vmem:[#allocation9_spill] sm:$0xff]  ;;  %v1059_v36 = vadd.f32 %v3439_v41, %v3260_v58  ;;  %v1064_v58 = vadd.f32 %v3467_v35, %v3280_v49 }
 0x1cf   : > { %v1058_v3 = vadd.f32 %v3443_v26, %v4238_v34 }
 0x1d2   : > { %1321 = vperm.xlu0 %2516, %v1026_v51   ;;  %1324 = vperm.xlu1 %2517, %v1027_v4   ;;  %v4239_v51 = vld [vmem:[#allocation11_spill] sm:$0xff] }
 0x1d3   : > { %v1060_v4 = vadd.f32 %v3451_v39, %v4239_v51 }
 0x1d6   : > { %1327 = vperm.xlu0 %2516, %v1028_v50   ;;  %1330 = vperm.xlu1 %2517, %v1029_v63   ;;  %v1061_v50 = vadd.f32 %v3445_v10, %v3272_v53  ;;  %v1062_v63 = vadd.f32 %v3459_v32, %v3270_v54  ;;  %v1066_v53 = vadd.f32 %v3475_v11, %v3286_v1  ;;  %v4241_v54 = vld [vmem:[#allocation12_spill] sm:$0xff] }
 0x1da   : > { %1333 = vperm.xlu0 %2516, %v1030_v62   ;;  %1336 = vperm.xlu1 %2517, %v1031_v17   ;;  %v1063_v62 = vadd.f32 %v3453_v22, %v3282_v0  ;;  %v1065_v17 = vadd.f32 %v3461_v44, %v3288_v25  ;;  %v1068_v0 = vadd.f32 %v3483_v45, %v4241_v54  ;;  %v4243_v25 = vld [vmem:[#allocation14_spill] sm:$0xff] }
 0x1de   : > { %1339 = vperm.xlu0 %2516, %v1032_v16   ;;  %1342 = vperm.xlu1 %2517, %v1033_v29   ;;  %v4240_v16 = vld [vmem:[#allocation13_spill] sm:$0xff] }
 0x1df   : > { %v1067_v29 = vadd.f32 %v3469_v55, %v4240_v16  ;;  %v4256_v16 = vld [vmem:[#allocation29_spill] sm:$0xff] }
 0x1e2   : > { %1345 = vperm.xlu0 %2516, %v1034_v28   ;;  %1348 = vperm.xlu1 %2517, %v1035_v48   ;;  %v4242_v28 = vld [vmem:[#allocation15_spill] sm:$0xff] }
 0x1e3   : > { %v1069_v48 = vadd.f32 %v3481_v56, %v4242_v28 }
 0x1e6   : > { %1351 = vperm.xlu0 %2516, %v1036_v47   ;;  %1354 = vperm.xlu1 %2517, %v1037_v7   ;;  %v1070_v47 = vadd.f32 %v3489_v5, %v4243_v25  ;;  %v4244_v7 = vld [vmem:[#allocation17_spill] sm:$0xff]  ;;  %v4257_v25 = vld [vmem:[#allocation28_spill] sm:$0xff] }
 0x1e7   : > { %v1071_v1 = vadd.f32 %v3431_v57, %v4244_v7  ;;  %v4258_v7 = vld [vmem:[#allocation31_spill] sm:$0xff] }
 0x1ea   : > { %1357 = vperm.xlu0 %2516, %v1038_v6   ;;  %1360 = vperm.xlu1 %2517, %v1039_v21  }
 0x1ee   : > { %1363 = vperm.xlu0 %2516, %v1040_v20   ;;  %1366 = vperm.xlu1 %2517, %v1041_v43   ;;  %v4245_v20 = vld [vmem:[#allocation16_spill] sm:$0xff] }
 0x1ef   : > { %v1072_v43 = vadd.f32 %v3429_v46, %v4245_v20 }
 0x1f2   : > { %1369 = vperm.xlu0 %2516, %v1042_v42   ;;  %1372 = vperm.xlu1 %2517, %v1043_v61   ;;  %v4246_v42 = vld [vmem:[#allocation19_spill] sm:$0xff] }
 0x1f3   : > { %v1073_v61 = vadd.f32 %v3437_v33, %v4246_v42 }
 0x1f6   : > { %1375 = vperm.xlu0 %2516, %v1044_v60   ;;  %1378 = vperm.xlu1 %2517, %v1045_v19  }
 0x1fa   : > { %1381 = vperm.xlu0 %2516, %v1046_v18   ;;  %1384 = vperm.xlu1 %2517, %v1047_v52   ;;  %v4247_v18 = vld [vmem:[#allocation18_spill] sm:$0xff] }
 0x1fb   : > { %v1074_v52 = vadd.f32 %v3443_v26, %v4247_v18 }
 0x1fe   : > { %1387 = vperm.xlu0 %2516, %v1048_v40   ;;  %1390 = vperm.xlu1 %2517, %v1049_v9   ;;  %v4248_v40 = vld [vmem:[#allocation21_spill] sm:$0xff] }
 0x1ff   : > { %v1075_v9 = vadd.f32 %v3439_v41, %v4248_v40  ;;  %v4259_v40 = vld [vmem:[#allocation30_spill] sm:$0xff] }
 0x202   : > { %1393 = vperm.xlu0 %2516, %v1050_v8   ;;  %1396 = vperm.xlu1 %2517, %v1051_v31  }
 0x206   : > { %1399 = vperm.xlu0 %2516, %v1052_v30   ;;  %1402 = vperm.xlu1 %2517, %v1053_v14   ;;  %v1076_v30 = vadd.f32 %v3451_v39, %v4249_v27  ;;  %v4250_v14 = vld [vmem:[#allocation23_spill] sm:$0xff]  ;;  %v4260_v27 = vld [vmem:[#allocation33_spill] sm:$0xff] }
 0x207   : > { %v1077_v2 = vadd.f32 %v3445_v10, %v4250_v14 }
 0x20a   : > { %1405 = vperm.xlu0 %2516, %v1054_v15   ;;  %1408 = vperm.xlu1 %2517, %v1055_v24   ;;  %v4251_v24 = vld [vmem:[#allocation22_spill] sm:$0xff] }
 0x20b   : > { %v1078_v38 = vadd.f32 %v3459_v32, %v4251_v24 }
 0x20e   : > { %1411 = vperm.xlu0 %2516, %v1056_v59   ;;  %1414 = vperm.xlu1 %2517, %v1057_v37   ;;  %v4252_v59 = vld [vmem:[#allocation25_spill] sm:$0xff] }
 0x20f   : > { %v1079_v23 = vadd.f32 %v3453_v22, %v4252_v59 }
 0x212   : > { %1417 = vperm.xlu0 %2516, %v1058_v3   ;;  %1420 = vperm.xlu1 %2517, %v1059_v36   ;;  %v1647_v3 = vlaneseq  ;;  %v4253_v36 = vld [vmem:[#allocation24_spill] sm:$0xff] }
 0x213   : > { %v1080_v51 = vadd.f32 %v3467_v35, %v4253_v36  ;;  %v4261_v36 = vld [vmem:[#allocation32_spill] sm:$0xff] }
 0x214   : > { %v3647_v28 = vshrl.u32 %v1647_v3, 7 }
 0x216   : > { %1423 = vperm.xlu0 %2516, %v1060_v4   ;;  %1426 = vperm.xlu1 %2517, %v1061_v50   ;;  %v4254_v4 = vld [vmem:[#allocation27_spill] sm:$0xff] }
 0x217   : > { %v1081_v50 = vadd.f32 %v3461_v44, %v4254_v4 }
 0x21a   : > { %1429 = vperm.xlu0 %2516, %v1062_v63   ;;  %1432 = vperm.xlu1 %2517, %v1063_v62  }
 0x21e   : > { %1435 = vperm.xlu0 %2516, %v1064_v58   ;;  %1438 = vperm.xlu1 %2517, %v1065_v17   ;;  %v3637_v58 = vand.u32 127, %v1647_v3  ;;  %v4255_v17 = vld [vmem:[#allocation26_spill] sm:$0xff] }
 0x220   : > { %v1660_v20 = vadd.s32 4294967280, %v3637_v58  ;;  %v3662_v18 = vsub.s32 %v3637_v58, %v3647_v28 }
 0x222   : > { %1441 = vperm.xlu0 %2516, %v1066_v53   ;;  %1444 = vperm.xlu1 %2517, %v1067_v29   ;;  %v1082_v53 = vadd.f32 %v3475_v11, %v4255_v17  ;;  %v1083_v29 = vadd.f32 %v3469_v55, %v4256_v16  ;;  %v3670_v14 = vsub.s32 %v1660_v20, %v3647_v28 }
 0x225   : > { %v3587_v49 = vpop.permute.xlu1 %1267  ;;  %v3593_v6 = vpop.permute.xlu0 %1264 }
 0x226   : > { %1447 = vperm.xlu0 %2516, %v1068_v0   ;;  %1450 = vperm.xlu1 %2517, %v1069_v48   ;;  %v1653_v48 = vadd.s32 4294967288, %v3637_v58 }
 0x229   : > { %v3595_v21 = vpop.permute.xlu1 %1270 }
 0x22a   : > { %1453 = vperm.xlu0 %2516, %v1070_v47   ;;  %1456 = vperm.xlu1 %2517, %v1071_v1   ;;  %v1084_v47 = vadd.f32 %v3483_v45, %v4257_v25  ;;  %v1085_v1 = vadd.f32 %v3481_v56, %v4258_v7 }
 0x22d   : > { %v3601_v60 = vpop.permute.xlu1 %1276  ;;  %v3603_v19 = vpop.permute.xlu0 %1273 }
 0x22e   : > { %1459 = vperm.xlu0 %2516, %v1072_v43   ;;  %1462 = vperm.xlu1 %2517, %v1073_v61   ;;  %v3658_v61 = vsub.s32 %v1653_v48, %v3647_v28  ;;  %v1688_v48 = vadd.s32 4294967248, %v3637_v58 }
 0x231   : > { %v3609_v8 = vpop.permute.xlu1 %1282  ;;  %v3611_v31 = vpop.permute.xlu0 %1279 }
 0x232   : > { %1465 = vperm.xlu0 %2516, %v1074_v52   ;;  %1468 = vperm.xlu1 %2517, %v1075_v9   ;;  %v1667_v52 = vadd.s32 4294967272, %v3637_v58  ;;  %v1086_v9 = vadd.f32 %v3489_v5, %v4259_v40 }
 0x234   : > { %v3679_v4 = vsub.s32 %v1667_v52, %v3647_v28 }
 0x235   : > { %v3617_v15 = vpop.permute.xlu1 %1288  ;;  %v3619_v13 = vpop.permute.xlu0 %1285 }
 0x236   : > { %1471 = vperm.xlu0 %2516, %v1076_v30   ;;  %1474 = vperm.xlu1 %2517, %v1077_v2   ;;  %v1087_v30 = vadd.f32 %v3431_v57, %v4260_v27  ;;  %v1674_v2 = vadd.s32 4294967264, %v3637_v58 }
 0x239   : > { %v3625_v37 = vpop.permute.xlu1 %1294  ;;  %v3627_v34 = vpop.permute.xlu0 %1291 }
 0x23a   : > { %1477 = vperm.xlu0 %2516, %v1078_v38   ;;  %1480 = vperm.xlu1 %2517, %v1079_v23  }
 0x23d   : > { %v3633_v63 = vpop.permute.xlu1 %1300  ;;  %v3635_v62 = vpop.permute.xlu0 %1297 }
 0x23e   : > { %1483 = vperm.xlu0 %2516, %v1080_v51   ;;  %1486 = vperm.xlu1 %2517, %v1081_v50   ;;  %v1088_v51 = vadd.f32 %v3429_v46, %v4261_v36  ;;  %v1681_v50 = vadd.s32 4294967256, %v3637_v58  ;;  %v1709_v36 = vadd.s32 4294967224, %v3637_v58 }
 0x240   : > { %v3695_v40 = vsub.s32 %v1681_v50, %v3647_v28 }
 0x241   : > { %v3643_v54 = vpop.permute.xlu1 %1306  ;;  %v3645_v0 = vpop.permute.xlu0 %1303 }
 0x242   : > { %1489 = vperm.xlu0 %2516, %v1082_v53   ;;  %1492 = vperm.xlu1 %2517, %v1083_v29   ;;  %v4262_v53 = vld [vmem:[#allocation35_spill] sm:$0xff]  ;;  %v3686_v29 = vsub.s32 %v1674_v2, %v3647_v28 }
 0x243   : > { %v1089_v16 = vadd.f32 %v3437_v33, %v4262_v53 }
 0x245   : > { %v1313_v43 = vpop.permute.xlu1 %1312  ;;  %v3655_v42 = vpop.permute.xlu0 %1309 }
 0x246   : > { %1495 = vperm.xlu0 %2516, %v1084_v47   ;;  %1498 = vperm.xlu1 %2517, %v1085_v1   ;;  %v1761_v59 = vrot.slane %v1313_v43, %v3662_v18  ;;  %v4263_v43 = vld [vmem:[#allocation37_spill] sm:$0xff] }
 0x247   : > { %v1091_v52 = vadd.f32 %v3439_v41, %v4263_v43 }
 0x249   : > { %v1319_v24 = vpop.permute.xlu1 %1318  ;;  %v1316_v38 = vpop.permute.xlu0 %1315 }
 0x24a   : > { %v1765_v23 = vrot.slane %v1316_v38, %v3658_v61  ;;  %1501 = vperm.xlu0 %2516, %v1086_v9   ;;  %1504 = vperm.xlu1 %2517, %v1087_v30   ;;  %v1770_v3 = vrot.slane %v1319_v24, %v3670_v14  ;;  %v1695_v9 = vadd.s32 4294967240, %v3637_v58  ;;  %v4264_v30 = vld [vmem:[#allocation34_spill] sm:$0xff]  ;;  %v3702_v24 = vsub.s32 %v1688_v48, %v3647_v28 }
 0x24b   : > { %v1090_v2 = vadd.f32 %v3443_v26, %v4264_v30  ;;  %v1702_v38 = vadd.s32 4294967232, %v3637_v58 }
 0x24c   : > { %v1766_v17 = vsel %vm1658_vm1, %v1765_v23, %v1761_v59 }
 0x24d   : > { %v1325_v25 = vpop.permute.xlu1 %1324  ;;  %v1322_v47 = vpop.permute.xlu0 %1321  ;;  %v1771_v20 = vsel %vm1665_vm2, %v1770_v3, %v1766_v17  ;;  %v3710_v17 = vsub.s32 %v1695_v9, %v3647_v28  ;;  %v3723_v9 = vsub.s32 %v1709_v36, %v3647_v28  ;;  %v1730_v36 = vadd.s32 4294967200, %v3637_v58 }
 0x24e   : > { %v1775_v7 = vrot.slane %v1322_v47, %v3679_v4  ;;  %1507 = vperm.xlu0 %2516, %v1088_v51   ;;  %1510 = vperm.xlu1 %2517, %v1089_v16   ;;  %v1780_v1 = vrot.slane %v1325_v25, %v3686_v29  ;;  %v4265_v16 = vld [vmem:[#allocation36_spill] sm:$0xff]  ;;  %v4266_v25 = vld [vmem:[#allocation39_spill] sm:$0xff] }
 0x24f   : > { %v1092_v48 = vadd.f32 %v3451_v39, %v4265_v16  ;;  %v1093_v47 = vadd.f32 %v3445_v10, %v4266_v25 }
 0x250   : > { %v1776_v27 = vsel %vm1672_vm3, %v1775_v7, %v1771_v20  ;;  %v3718_v7 = vsub.s32 %v1702_v38, %v3647_v28  ;;  %v1716_v20 = vadd.s32 4294967216, %v3637_v58 }
 0x251   : > { %v1331_v59 = vpop.permute.xlu1 %1330  ;;  %v1328_v23 = vpop.permute.xlu0 %1327  ;;  %v1781_v50 = vsel %vm1679_vm4, %v1780_v1, %v1776_v27 }
 0x252   : > { %v1785_v3 = vrot.slane %v1328_v23, %v3695_v40  ;;  %1513 = vperm.xlu0 %2516, %v1090_v2   ;;  %1516 = vperm.xlu1 %2517, %v1091_v52   ;;  %v1790_v51 = vrot.slane %v1331_v59, %v3702_v24  ;;  %v1723_v2 = vadd.s32 4294967208, %v3637_v58  ;;  %v4267_v59 = vld [vmem:[#allocation38_spill] sm:$0xff]  ;;  %v3734_v16 = vsub.s32 %v1716_v20, %v3647_v28 }
 0x253   : > { %v1094_v23 = vadd.f32 %v3459_v32, %v4267_v59  ;;  %v4270_v59 = vld [vmem:[#allocation43_spill] sm:$0xff] }
 0x254   : > { %v1786_v53 = vsel %vm1686_vm5, %v1785_v3, %v1781_v50  ;;  %v4268_v3 = vld [vmem:[#allocation41_spill] sm:$0xff] }
 0x255   : > { %v1337_v43 = vpop.permute.xlu1 %1336  ;;  %v1334_v52 = vpop.permute.xlu0 %1333  ;;  %v1791_v30 = vsel %vm1693_vm6, %v1790_v51, %v1786_v53  ;;  %v1095_v50 = vadd.f32 %v3453_v22, %v4268_v3  ;;  %v1737_v53 = vadd.s32 4294967192, %v3637_v58  ;;  %v1097_v3 = vadd.f32 %v3461_v44, %v4270_v59 }
 0x256   : > { %v1795_v1 = vrot.slane %v1334_v52, %v3710_v17  ;;  %1519 = vperm.xlu0 %2516, %v1092_v48   ;;  %1522 = vperm.xlu1 %2517, %v1093_v47   ;;  %v1800_v27 = vrot.slane %v1337_v43, %v3718_v7  ;;  %v3742_v52 = vsub.s32 %v1723_v2, %v3647_v28 }
 0x257   : > { %v3755_v2 = vsub.s32 %v1737_v53, %v3647_v28 }
 0x258   : > { %v1796_v38 = vsel %vm1700_vm7, %v1795_v1, %v1791_v30  ;;  %v4269_v1 = vld [vmem:[#allocation40_spill] sm:$0xff] }
 0x259   : > { %v1343_v48 = vpop.permute.xlu1 %1342  ;;  %v1340_v25 = vpop.permute.xlu0 %1339  ;;  %v1801_v43 = vsel %vm1707_vm8, %v1800_v27, %v1796_v38  ;;  %v1096_v30 = vadd.f32 %v3467_v35, %v4269_v1  ;;  %v4271_v1 = vld [vmem:[#allocation42_spill] sm:$0xff] }
 0x25a   : > { %v1805_v51 = vrot.slane %v1340_v25, %v3723_v9  ;;  %1525 = vperm.xlu0 %2516, %v1094_v23   ;;  %1528 = vperm.xlu1 %2517, %v1095_v50   ;;  %v1810_v47 = vrot.slane %v1343_v48, %v3734_v16  ;;  %v3750_v23 = vsub.s32 %v1730_v36, %v3647_v28  ;;  %v1744_v50 = vadd.s32 4294967184, %v3637_v58 }
 0x25b   : > { %v1751_v36 = vadd.s32 4294967176, %v3637_v58  ;;  %v1098_v59 = vadd.f32 %v3475_v11, %v4271_v1 }
 0x25c   : > { %v1806_v20 = vsel %vm1714_vm9, %v1805_v51, %v1801_v43 }
 0x25d   : > { %v1349_v25 = vpop.permute.xlu1 %1348  ;;  %v1346_v48 = vpop.permute.xlu0 %1345  ;;  %v1811_v51 = vsel %vm1721_vm10, %v1810_v47, %v1806_v20  ;;  %v3772_v20 = vsub.s32 %v1751_v36, %v3647_v28 }
 0x25e   : > { %v1815_v27 = vrot.slane %v1346_v48, %v3742_v52  ;;  %1531 = vperm.xlu0 %2516, %v1096_v30   ;;  %1534 = vperm.xlu1 %2517, %v1097_v3   ;;  %v1820_v38 = vrot.slane %v1349_v25, %v3750_v23  ;;  %v1099_v48 = vadd.f32 %v3469_v55, %v4272_v12 }
 0x25f   : > { %v3766_v30 = vsub.s32 %v1744_v50, %v3647_v28  ;;  %v1652_v28 = vrot.slane %v3593_v6, %v3662_v18 }
 0x260   : > { %v1816_v43 = vsel %vm1728_vm11, %v1815_v27, %v1811_v51  ;;  %v4273_v27 = vld [vmem:[#allocation44_spill] sm:$0xff]  ;;  %v4274_v51 = vld [vmem:[#allocation47_spill] sm:$0xff] }
 0x261   : > { %v1355_v3 = vpop.permute.xlu1 %1354  ;;  %v1352_v53 = vpop.permute.xlu0 %1351  ;;  %v1821_v47 = vsel %vm4154_vm12, %v1820_v38, %v1816_v43  ;;  %v1100_v50 = vadd.f32 %v3483_v45, %v4273_v27  ;;  %v1101_v1 = vadd.f32 %v3481_v56, %v4274_v51  ;;  %v1657_v38 = vrot.slane %v3587_v49, %v3658_v61 }
 0x262   : > { %v1825_v25 = vrot.slane %v1352_v53, %v3755_v2  ;;  %1537 = vperm.xlu0 %2516, %v1098_v59   ;;  %1540 = vperm.xlu1 %2517, %v1099_v48   ;;  %v1830_v58 = vrot.slane %v1355_v3, %v3766_v30  ;;  %v1664_v43 = vrot.slane %v3595_v21, %v3670_v14  ;;  %v4275_v3 = vld [vmem:[#allocation46_spill] sm:$0xff] }
 0x263   : > { %v1671_v49 = vrot.slane %v3603_v19, %v3679_v4  ;;  %v1678_v19 = vrot.slane %v3601_v60, %v3686_v29  ;;  %v4279_v60 = vld [vmem:[#allocation53_spill] sm:$0xff] }
 0x264   : > { %v1826_v12 = vsel %vm1742_vm13, %v1825_v25, %v1821_v47  ;;  %v1102_v25 = vadd.f32 %v3489_v5, %v4275_v3  ;;  %v4276_v47 = vld [vmem:[#allocation49_spill] sm:$0xff]  ;;  %v4278_v3 = vld [vmem:[#allocation51_spill] sm:$0xff] }
 0x265   : > { %v1361_v55 = vpop.permute.xlu1 %1360  ;;  %v1358_v53 = vpop.permute.xlu0 %1357  ;;  %v1831_v36 = vsel %vm1749_vm14, %v1830_v58, %v1826_v12  ;;  %v1103_v27 = vadd.f32 %v3431_v57, %v4276_v47  ;;  %v1659_v12 = vsel %vm1658_vm1, %v1657_v38, %v1652_v28 }
 0x266   : > { %v1835_v59 = vrot.slane %v1358_v53, %v3772_v20  ;;  %1543 = vperm.xlu0 %2516, %v1100_v50   ;;  %1546 = vperm.xlu1 %2517, %v1101_v1   ;;  %v1840_v51 = vrot.slane %v1361_v55, %v3662_v18  ;;  %v4277_v1 = vld [vmem:[#allocation48_spill] sm:$0xff]  ;;  %v1105_v55 = vadd.f32 %v3437_v33, %v4278_v3 }
 0x267   : > { %v1104_v53 = vadd.f32 %v3429_v46, %v4277_v1  ;;  %v1699_v1 = vrot.slane %v3619_v13, %v3710_v17 }
 0x268   : > { %v3788_v48 = vsel %vm1756_vm15, %v1835_v59, %v1831_v36  ;;  %v1666_v59 = vsel %vm1665_vm2, %v1664_v43, %v1659_v12 }
 0x269   : > { %v1367_v50 = vpop.permute.xlu1 %1366  ;;  %v1364_v6 = vpop.permute.xlu0 %1363  ;;  %v1673_v47 = vsel %vm1672_vm3, %v1671_v49, %v1666_v59 }
 0x26a   : > { %v1849_v58 = vrot.slane %v1367_v50, %v3670_v14  ;;  %v1844_v21 = vrot.slane %v1364_v6, %v3658_v61  ;;  %1549 = vperm.xlu0 %2516, %v1102_v25   ;;  %1552 = vperm.xlu1 %2517, %v1103_v27   ;;  %v1685_v25 = vrot.slane %v3611_v31, %v3695_v40 }
 0x26b   : > { %v1107_v6 = vadd.f32 %v3439_v41, %v4279_v60  ;;  %v1680_v49 = vsel %vm1679_vm4, %v1678_v19, %v1673_v47  ;;  %v4281_v19 = vld [vmem:[#allocation55_spill] sm:$0xff]  ;;  %v1706_v47 = vrot.slane %v3617_v15, %v3718_v7 }
 0x26c   : > { %v1845_v36 = vsel %vm1658_vm1, %v1844_v21, %v1840_v51  ;;  %v1692_v51 = vrot.slane %v3609_v8, %v3702_v24  ;;  %v4280_v21 = vld [vmem:[#allocation50_spill] sm:$0xff]  ;;  %v1687_v12 = vsel %vm1686_vm5, %v1685_v25, %v1680_v49 }
 0x26d   : > { %v1373_v27 = vpop.permute.xlu1 %1372  ;;  %v1850_v38 = vsel %vm1665_vm2, %v1849_v58, %v1845_v36  ;;  %v1370_v28 = vpop.permute.xlu0 %1369  ;;  %v1106_v58 = vadd.f32 %v3443_v26, %v4280_v21  ;;  %v4283_v21 = vld [vmem:[#allocation57_spill] sm:$0xff] }
 0x26e   : > { %v1859_v50 = vrot.slane %v1373_v27, %v3686_v29  ;;  %v1854_v43 = vrot.slane %v1370_v28, %v3679_v4  ;;  %1558 = vperm.xlu1 %2517, %v1105_v55   ;;  %1555 = vperm.xlu0 %2516, %v1104_v53   ;;  %v1109_v55 = vadd.f32 %v3445_v10, %v4281_v19  ;;  %v4282_v27 = vld [vmem:[#allocation52_spill] sm:$0xff] }
 0x26f   : > { %v1694_v25 = vsel %vm1693_vm6, %v1692_v51, %v1687_v12  ;;  %v4284_v12 = vld [vmem:[#allocation54_spill] sm:$0xff] }
 0x270   : > { %v1855_v31 = vsel %vm1672_vm3, %v1854_v43, %v1850_v38  ;;  %v1108_v38 = vadd.f32 %v3451_v39, %v4282_v27  ;;  %v1701_v28 = vsel %vm1700_vm7, %v1699_v1, %v1694_v25  ;;  %v1720_v1 = vrot.slane %v3625_v37, %v3734_v16  ;;  %v4285_v25 = vld [vmem:[#allocation59_spill] sm:$0xff] }
 0x271   : > { %v1379_v59 = vpop.permute.xlu1 %1378  ;;  %v1860_v53 = vsel %vm1679_vm4, %v1859_v50, %v1855_v31  ;;  %v1376_v36 = vpop.permute.xlu0 %1375  ;;  %v1713_v50 = vrot.slane %v3627_v34, %v3723_v9  ;;  %v1708_v51 = vsel %vm1707_vm8, %v1706_v47, %v1701_v28  ;;  %v1110_v34 = vadd.f32 %v3459_v32, %v4284_v12 }
 0x272   : > { %v1869_v3 = vrot.slane %v1379_v59, %v3702_v24  ;;  %v1864_v8 = vrot.slane %v1376_v36, %v3695_v40  ;;  %1564 = vperm.xlu1 %2517, %v1107_v6   ;;  %1561 = vperm.xlu0 %2516, %v1106_v58   ;;  %v1111_v58 = vadd.f32 %v3453_v22, %v4283_v21  ;;  %v4288_v21 = vld [vmem:[#allocation58_spill] sm:$0xff] }
 0x273   : > { %v1715_v59 = vsel %vm1714_vm9, %v1713_v50, %v1708_v51  ;;  %v1113_v37 = vadd.f32 %v3461_v44, %v4285_v25 }
 0x274   : > { %v1865_v13 = vsel %vm1686_vm5, %v1864_v8, %v1860_v53  ;;  %v1727_v8 = vrot.slane %v3635_v62, %v3742_v52  ;;  %v1722_v28 = vsel %vm1721_vm10, %v1720_v1, %v1715_v59 }
 0x275   : > { %v1385_v43 = vpop.permute.xlu1 %1384  ;;  %v1870_v60 = vsel %vm1693_vm6, %v1869_v3, %v1865_v13  ;;  %v1382_v6 = vpop.permute.xlu0 %1381  ;;  %v4286_v13 = vld [vmem:[#allocation56_spill] sm:$0xff] }
 0x276   : > { %v1879_v49 = vrot.slane %v1385_v43, %v3718_v7  ;;  %v1874_v15 = vrot.slane %v1382_v6, %v3710_v17  ;;  %1570 = vperm.xlu1 %2517, %v1109_v55   ;;  %1567 = vperm.xlu0 %2516, %v1108_v38   ;;  %v1112_v27 = vadd.f32 %v3467_v35, %v4286_v13 }
 0x277   : > { %v1734_v38 = vrot.slane %v3633_v63, %v3750_v23  ;;  %v4287_v63 = vld [vmem:[#allocation65_spill] sm:$0xff] }
 0x278   : > { %v1875_v31 = vsel %vm1700_vm7, %v1874_v15, %v1870_v60  ;;  %v1729_v60 = vsel %vm1728_vm11, %v1727_v8, %v1722_v28  ;;  %v1741_v15 = vrot.slane %v3645_v0, %v3755_v2 }
 0x279   : > { %v1391_v53 = vpop.permute.xlu1 %1390  ;;  %v1880_v36 = vsel %vm1707_vm8, %v1879_v49, %v1875_v31  ;;  %v1388_v3 = vpop.permute.xlu0 %1387  ;;  %v1119_v31 = vadd.f32 %v3431_v57, %v4287_v63  ;;  %v1736_v12 = vsel %vm4154_vm12, %v1734_v38, %v1729_v60 }
 0x27a   : > { %v1889_v19 = vrot.slane %v1391_v53, %v3734_v16  ;;  %v1884_v55 = vrot.slane %v1388_v3, %v3723_v9  ;;  %1576 = vperm.xlu1 %2517, %v1111_v58   ;;  %1573 = vperm.xlu0 %2516, %v1110_v34   ;;  %v1114_v58 = vadd.f32 %v3475_v11, %v4288_v21  ;;  %v4294_v21 = vld [vmem:[#allocation68_spill] sm:$0xff] }
 0x27b   : > { %v1748_v53 = vrot.slane %v3643_v54, %v3766_v30  ;;  %v1743_v57 = vsel %vm1742_vm13, %v1741_v15, %v1736_v12  ;;  %v1755_v3 = vrot.slane %v3655_v42, %v3772_v20 }
 0x27c   : > { %v1885_v47 = vsel %vm1714_vm9, %v1884_v55, %v1880_v36 }
 0x27d   : > { %v1397_v62 = vpop.permute.xlu1 %1396  ;;  %v1890_v50 = vsel %vm1721_vm10, %v1889_v19, %v1885_v47  ;;  %v1394_v43 = vpop.permute.xlu0 %1393  ;;  %v4289_v19 = vld [vmem:[#allocation67_spill] sm:$0xff]  ;;  %v4290_v47 = vld [vmem:[#allocation64_spill] sm:$0xff] }
 0x27e   : > { %v1899_v6 = vrot.slane %v1397_v62, %v3750_v23  ;;  %v1894_v49 = vrot.slane %v1394_v43, %v3742_v52  ;;  %1582 = vperm.xlu1 %2517, %v1113_v37   ;;  %1579 = vperm.xlu0 %2516, %v1112_v27   ;;  %v1121_v55 = vadd.f32 %v3437_v33, %v4289_v19  ;;  %v4291_v62 = vld [vmem:[#allocation69_spill] sm:$0xff] }
 0x27f   : > { %v1120_v25 = vadd.f32 %v3429_v46, %v4290_v47  ;;  %v1750_v27 = vsel %vm1749_vm14, %v1748_v53, %v1743_v57  ;;  %v1123_v46 = vadd.f32 %v3439_v41, %v4291_v62  ;;  %v4296_v57 = vld [vmem:[#allocation70_spill] sm:$0xff] }
 0x280   : > { %v1895_v51 = vsel %vm1728_vm11, %v1894_v49, %v1890_v50  ;;  %v1757_v42 = vsel %vm1756_vm15, %v1755_v3, %v1750_v27  ;;  %v4292_v50 = vld [vmem:[#allocation66_spill] sm:$0xff] }
 0x281   : > { %v1403_v34 = vpop.permute.xlu1 %1402  ;;  %v1900_v1 = vsel %vm4154_vm12, %v1899_v6, %v1895_v51  ;;  %v1400_v59 = vpop.permute.xlu0 %1399  ;;  %vm2313_vm12 = vcmask 1042434   ;;  %v2312_v28 = vsel %vm2311_vm0, %v3788_v48, %v1757_v42  ;;  %v1122_v43 = vadd.f32 %v3443_v26, %v4292_v50 }
 0x282   : > { %v1909_v36 = vrot.slane %v1403_v34, %v3766_v30  ;;  %v1904_v0 = vrot.slane %v1400_v59, %v3755_v2  ;;  %1600 = vperm.xlu1 %2517, %v1119_v31   ;;  %1585 = vperm.xlu0 %2516, %v1114_v58   ;;  %v4293_v31 = vld [vmem:[#allocation71_spill] sm:$0xff]  ;;  %v1124_v26 = vadd.f32 %v3451_v39, %v4294_v21  ;;  %vm2315_vm0 = vcmask 1043459  }
 0x283   : > { %v1125_v41 = vadd.f32 %v3445_v10, %v4293_v31  ;;  %v1126_v10 = vadd.f32 %v3459_v32, %v4296_v57  ;;  %v4303_v31 = vld [vmem:[#allocation60_spill] sm:$0xff] }
 0x284   : > { %v1905_v8 = vsel %vm1742_vm13, %v1904_v0, %v1900_v1 }
 0x285   : > { %v1409_v54 = vpop.permute.xlu1 %1408  ;;  %v1910_v37 = vsel %vm1749_vm14, %v1909_v36, %v1905_v8  ;;  %v1406_v13 = vpop.permute.xlu0 %1405  ;;  %v4295_v36 = vld [vmem:[#allocation73_spill] sm:$0xff] }
 0x286   : > { %v1914_v38 = vrot.slane %v1406_v13, %v3772_v20  ;;  %1606 = vperm.xlu1 %2517, %v1121_v55   ;;  %1603 = vperm.xlu0 %2516, %v1120_v25   ;;  %v1919_v15 = vrot.slane %v1409_v54, %v3662_v18  ;;  %v1127_v0 = vadd.f32 %v3453_v22, %v4295_v36  ;;  %v4297_v25 = vld [vmem:[#allocation75_spill] sm:$0xff] }
 0x287   : > { %v1129_v54 = vadd.f32 %v3461_v44, %v4297_v25  ;;  %v4301_v44 = vld [vmem:[#allocation80_spill] sm:$0xff] }
 0x288   : > { %v1915_v33 = vsel %vm1756_vm15, %v1914_v38, %v1910_v37  ;;  %v4298_v37 = vld [vmem:[#allocation72_spill] sm:$0xff] }
 0x289   : > { %v3899_v60 = vsel %vm2313_vm12, %v1915_v33, %v2312_v28  ;;  %v1415_v6 = vpop.permute.xlu1 %1414  ;;  %v1412_v49 = vpop.permute.xlu0 %1411  ;;  %v1128_v22 = vadd.f32 %v3467_v35, %v4298_v37  ;;  %v4299_v33 = vld [vmem:[#allocation74_spill] sm:$0xff]  ;;  %vm4306_vm12 = vcmask 851712  }
 0x28a   : > { %v1928_v51 = vrot.slane %v1415_v6, %v3670_v14  ;;  %v1923_v63 = vrot.slane %v1412_v49, %v3658_v61  ;;  %1612 = vperm.xlu1 %2517, %v1123_v46   ;;  %1609 = vperm.xlu0 %2516, %v1122_v43   ;;  %v1130_v62 = vadd.f32 %v3475_v11, %v4299_v33  ;;  %v4300_v46 = vld [vmem:[#allocation61_spill] sm:$0xff] }
 0x28b   : > { %v1115_v50 = vadd.f32 %v4301_v44, %v4300_v46  ;;  %v1116_v11 = vadd.f32 %v3483_v45, %v4303_v31 }
 0x28c   : > { %v1924_v48 = vsel %vm1658_vm1, %v1923_v63, %v1919_v15  ;;  %v4302_v63 = vld [vmem:[#allocation77_spill] sm:$0xff] }
 0x28d   : > { %v1421_v58 = vpop.permute.xlu1 %1420  ;;  %v1929_v12 = vsel %vm1665_vm2, %v1928_v51, %v1924_v48  ;;  %v1418_v34 = vpop.permute.xlu0 %1417  ;;  %v1131_v48 = vadd.f32 %v4301_v44, %v4302_v63 }
 0x28e   : > { %v1938_v1 = vrot.slane %v1421_v58, %v3686_v29  ;;  %v1933_v59 = vrot.slane %v1418_v34, %v3679_v4  ;;  %1618 = vperm.xlu1 %2517, %v1125_v41   ;;  %1615 = vperm.xlu0 %2516, %v1124_v26  }
 0x290   : > { %v1934_v53 = vsel %vm1672_vm3, %v1933_v59, %v1929_v12 }
 0x291   : > { %v1427_v3 = vpop.permute.xlu1 %1426  ;;  %v1939_v39 = vsel %vm1679_vm4, %v1938_v1, %v1934_v53  ;;  %v1424_v8 = vpop.permute.xlu0 %1423  ;;  %v4304_v1 = vld [vmem:[#allocation76_spill] sm:$0xff]  ;;  %v4305_v53 = vld [vmem:[#allocation63_spill] sm:$0xff] }
 0x292   : > { %v1948_v19 = vrot.slane %v1427_v3, %v3702_v24  ;;  %v1943_v55 = vrot.slane %v1424_v8, %v3695_v40  ;;  %1624 = vperm.xlu1 %2517, %v1127_v0   ;;  %1621 = vperm.xlu0 %2516, %v1126_v10   ;;  %v1132_v59 = vadd.f32 %v3483_v45, %v4304_v1 }
 0x293   : > { %v1117_v36 = vadd.f32 %v3481_v56, %v4305_v53 }
 0x294   : > { %v1944_v47 = vsel %vm1686_vm5, %v1943_v55, %v1939_v39 }
 0x295   : > { %v1433_v13 = vpop.permute.xlu1 %1432  ;;  %v1949_v32 = vsel %vm1693_vm6, %v1948_v19, %v1944_v47  ;;  %v1430_v27 = vpop.permute.xlu0 %1429  ;;  %v4307_v19 = vld [vmem:[#allocation79_spill] sm:$0xff]  ;;  %v4308_v47 = vld [vmem:[#allocation62_spill] sm:$0xff] }
 0x296   : > { %v1958_v38 = vrot.slane %v1433_v13, %v3718_v7  ;;  %v1953_v42 = vrot.slane %v1430_v27, %v3710_v17  ;;  %1630 = vperm.xlu1 %2517, %v1129_v54   ;;  %1627 = vperm.xlu0 %2516, %v1128_v22   ;;  %v1133_v55 = vadd.f32 %v3481_v56, %v4307_v19 }
 0x297   : > { %v1118_v45 = vadd.f32 %v3489_v5, %v4308_v47 }
 0x298   : > { %v1954_v28 = vsel %vm1700_vm7, %v1953_v42, %v1949_v32  ;;  %v4309_v32 = vld [vmem:[#allocation78_spill] sm:$0xff] }
 0x299   : > { %v1439_v43 = vpop.permute.xlu1 %1438  ;;  %v1959_v35 = vsel %vm1707_vm8, %v1958_v38, %v1954_v28  ;;  %v1436_v6 = vpop.permute.xlu0 %1435  ;;  %v1134_v27 = vadd.f32 %v3489_v5, %v4309_v32 }
 0x29a   : > { %v1968_v49 = vrot.slane %v1439_v43, %v3734_v16  ;;  %v1963_v15 = vrot.slane %v1436_v6, %v3723_v9  ;;  %1633 = vperm.xlu1 %2517, %v1130_v62   ;;  %1588 = vperm.xlu0 %2516, %v1115_v50  }
 0x29c   : > { %v1964_v51 = vsel %vm1714_vm9, %v1963_v15, %v1959_v35 }
 0x29d   : > { %v1445_v41 = vpop.permute.xlu1 %1444  ;;  %v1969_v21 = vsel %vm1721_vm10, %v1968_v49, %v1964_v51  ;;  %v1442_v26 = vpop.permute.xlu0 %1441 }
 0x29e   : > { %v1978_v58 = vrot.slane %v1445_v41, %v3750_v23  ;;  %v1973_v12 = vrot.slane %v1442_v26, %v3742_v52  ;;  %1636 = vperm.xlu1 %2517, %v1131_v48   ;;  %1591 = vperm.xlu0 %2516, %v1116_v11  }
 0x2a0   : > { %v1974_v34 = vsel %vm1728_vm11, %v1973_v12, %v1969_v21 }
 0x2a1   : > { %v1451_v0 = vpop.permute.xlu1 %1450  ;;  %v1979_v57 = vsel %vm4306_vm12, %v1978_v58, %v1974_v34  ;;  %v1448_v10 = vpop.permute.xlu0 %1447 }
 0x2a2   : > { %v1988_v3 = vrot.slane %v1451_v0, %v3766_v30  ;;  %v1983_v39 = vrot.slane %v1448_v10, %v3755_v2  ;;  %1639 = vperm.xlu1 %2517, %v1132_v59   ;;  %1594 = vperm.xlu0 %2516, %v1117_v36  }
 0x2a4   : > { %v1984_v8 = vsel %vm1742_vm13, %v1983_v39, %v1979_v57 }
 0x2a5   : > { %v1457_v25 = vpop.permute.xlu1 %1456  ;;  %v1989_v54 = vsel %vm1749_vm14, %v1988_v3, %v1984_v8  ;;  %v1454_v37 = vpop.permute.xlu0 %1453 }
 0x2a6   : > { %v1993_v22 = vrot.slane %v1454_v37, %v3772_v20  ;;  %1642 = vperm.xlu1 %2517, %v1133_v55   ;;  %1597 = vperm.xlu0 %2516, %v1118_v45   ;;  %v1998_v28 = vrot.slane %v1457_v25, %v3662_v18 }
 0x2a8   : > { %v1994_v13 = vsel %vm1756_vm15, %v1993_v22, %v1989_v54 }
 0x2a9   : > { %v2316_v38 = vsel %vm2315_vm0, %v1994_v13, %v3899_v60  ;;  %v1463_v56 = vpop.permute.xlu1 %1462  ;;  %v1460_v42 = vpop.permute.xlu0 %1459  ;;  %vm2317_vm0 = vcmask 1044484  }
 0x2aa   : > { %v2007_v33 = vrot.slane %v1463_v56, %v3670_v14  ;;  %v2002_v62 = vrot.slane %v1460_v42, %v3658_v61  ;;  %1645 = vperm.xlu0 %2516, %v1134_v27  }
 0x2ac   : > { %v2003_v46 = vsel %vm1658_vm1, %v2002_v62, %v1998_v28 }
 0x2ad   : > { %v1469_v44 = vpop.permute.xlu1 %1468  ;;  %v2008_v50 = vsel %vm1665_vm2, %v2007_v33, %v2003_v46  ;;  %v1466_v43 = vpop.permute.xlu0 %1465 }
 0x2ae   : > { %v2017_v35 = vrot.slane %v1469_v44, %v3686_v29  ;;  %v2012_v5 = vrot.slane %v1466_v43, %v3679_v4 }
 0x2b0   : > { %v2013_v60 = vsel %vm1672_vm3, %v2012_v5, %v2008_v50 }
 0x2b1   : > { %v1475_v6 = vpop.permute.xlu1 %1474  ;;  %v2018_v49 = vsel %vm1679_vm4, %v2017_v35, %v2013_v60  ;;  %v1472_v15 = vpop.permute.xlu0 %1471 }
 0x2b2   : > { %v2027_v51 = vrot.slane %v1475_v6, %v3702_v24  ;;  %v2022_v63 = vrot.slane %v1472_v15, %v3695_v40 }
 0x2b4   : > { %v2023_v48 = vsel %vm1686_vm5, %v2022_v63, %v2018_v49 }
 0x2b5   : > { %v1481_v31 = vpop.permute.xlu1 %1480  ;;  %v2028_v11 = vsel %vm1693_vm6, %v2027_v51, %v2023_v48  ;;  %v1478_v41 = vpop.permute.xlu0 %1477 }
 0x2b6   : > { %v2037_v21 = vrot.slane %v1481_v31, %v3718_v7  ;;  %v2032_v26 = vrot.slane %v1478_v41, %v3710_v17 }
 0x2b8   : > { %v2033_v58 = vsel %vm1700_vm7, %v2032_v26, %v2028_v11 }
 0x2b9   : > { %v1487_v12 = vpop.permute.xlu1 %1486  ;;  %v2038_v34 = vsel %vm1707_vm8, %v2037_v21, %v2033_v58  ;;  %v1484_v1 = vpop.permute.xlu0 %1483 }
 0x2ba   : > { %v2047_v59 = vrot.slane %v1487_v12, %v3734_v16  ;;  %v2042_v53 = vrot.slane %v1484_v1, %v3723_v9 }
 0x2bc   : > { %v2043_v36 = vsel %vm1714_vm9, %v2042_v53, %v2038_v34 }
 0x2bd   : > { %v1493_v0 = vpop.permute.xlu1 %1492  ;;  %v2048_v57 = vsel %vm1721_vm10, %v2047_v59, %v2043_v36  ;;  %v1490_v10 = vpop.permute.xlu0 %1489 }
 0x2be   : > { %v2057_v3 = vrot.slane %v1493_v0, %v3750_v23  ;;  %v2052_v39 = vrot.slane %v1490_v10, %v3742_v52 }
 0x2c0   : > { %v2053_v8 = vsel %vm1728_vm11, %v2052_v39, %v2048_v57 }
 0x2c1   : > { %v1499_v19 = vpop.permute.xlu1 %1498  ;;  %v2058_v55 = vsel %vm4306_vm12, %v2057_v3, %v2053_v8  ;;  %v1496_v47 = vpop.permute.xlu0 %1495 }
 0x2c2   : > { %v2067_v45 = vrot.slane %v1499_v19, %v3766_v30  ;;  %v2062_v25 = vrot.slane %v1496_v47, %v3755_v2 }
 0x2c4   : > { %v2063_v54 = vsel %vm1742_vm13, %v2062_v25, %v2058_v55 }
 0x2c5   : > { %v1505_v37 = vpop.permute.xlu1 %1504  ;;  %v2068_v22 = vsel %vm1749_vm14, %v2067_v45, %v2063_v54  ;;  %v1502_v13 = vpop.permute.xlu0 %1501 }
 0x2c6   : > { %v2072_v32 = vrot.slane %v1502_v13, %v3772_v20  ;;  %v2077_v33 = vrot.slane %v1505_v37, %v3662_v18 }
 0x2c8   : > { %v2073_v27 = vsel %vm1756_vm15, %v2072_v32, %v2068_v22 }
 0x2c9   : > { %v2318_v56 = vsel %vm2317_vm0, %v2073_v27, %v2316_v38  ;;  %v1511_v42 = vpop.permute.xlu1 %1510  ;;  %v1508_v28 = vpop.permute.xlu0 %1507  ;;  %vm2319_vm0 = vcmask 1045509  }
 0x2ca   : > { %v2086_v62 = vrot.slane %v1511_v42, %v3670_v14  ;;  %v2081_v46 = vrot.slane %v1508_v28, %v3658_v61 }
 0x2cc   : > { %v2082_v44 = vsel %vm1658_vm1, %v2081_v46, %v2077_v33 }
 0x2cd   : > { %v1517_v50 = vpop.permute.xlu1 %1516  ;;  %v2087_v43 = vsel %vm1665_vm2, %v2086_v62, %v2082_v44  ;;  %v1514_v35 = vpop.permute.xlu0 %1513 }
 0x2ce   : > { %v2096_v5 = vrot.slane %v1517_v50, %v3686_v29  ;;  %v2091_v60 = vrot.slane %v1514_v35, %v3679_v4 }
 0x2d0   : > { %v2092_v38 = vsel %vm1672_vm3, %v2091_v60, %v2087_v43 }
 0x2d1   : > { %v1523_v6 = vpop.permute.xlu1 %1522  ;;  %v2097_v49 = vsel %vm1679_vm4, %v2096_v5, %v2092_v38  ;;  %v1520_v15 = vpop.permute.xlu0 %1519 }
 0x2d2   : > { %v2106_v51 = vrot.slane %v1523_v6, %v3702_v24  ;;  %v2101_v63 = vrot.slane %v1520_v15, %v3695_v40 }
 0x2d4   : > { %v2102_v48 = vsel %vm1686_vm5, %v2101_v63, %v2097_v49 }
 0x2d5   : > { %v1529_v31 = vpop.permute.xlu1 %1528  ;;  %v2107_v11 = vsel %vm1693_vm6, %v2106_v51, %v2102_v48  ;;  %v1526_v41 = vpop.permute.xlu0 %1525 }
 0x2d6   : > { %v2116_v21 = vrot.slane %v1529_v31, %v3718_v7  ;;  %v2111_v26 = vrot.slane %v1526_v41, %v3710_v17 }
 0x2d8   : > { %v2112_v58 = vsel %vm1700_vm7, %v2111_v26, %v2107_v11 }
 0x2d9   : > { %v1535_v12 = vpop.permute.xlu1 %1534  ;;  %v2117_v34 = vsel %vm1707_vm8, %v2116_v21, %v2112_v58  ;;  %v1532_v1 = vpop.permute.xlu0 %1531 }
 0x2da   : > { %v2126_v59 = vrot.slane %v1535_v12, %v3734_v16  ;;  %v2121_v53 = vrot.slane %v1532_v1, %v3723_v9 }
 0x2dc   : > { %v2122_v36 = vsel %vm1714_vm9, %v2121_v53, %v2117_v34 }
 0x2dd   : > { %v1541_v0 = vpop.permute.xlu1 %1540  ;;  %v2127_v57 = vsel %vm1721_vm10, %v2126_v59, %v2122_v36  ;;  %v1538_v10 = vpop.permute.xlu0 %1537 }
 0x2de   : > { %v2136_v3 = vrot.slane %v1541_v0, %v3750_v23  ;;  %v2131_v39 = vrot.slane %v1538_v10, %v3742_v52 }
 0x2e0   : > { %v2132_v8 = vsel %vm1728_vm11, %v2131_v39, %v2127_v57 }
 0x2e1   : > { %v1547_v19 = vpop.permute.xlu1 %1546  ;;  %v2137_v55 = vsel %vm4306_vm12, %v2136_v3, %v2132_v8  ;;  %v1544_v47 = vpop.permute.xlu0 %1543 }
 0x2e2   : > { %v2141_v45 = vrot.slane %v1544_v47, %v3755_v2  ;;  %v2146_v25 = vrot.slane %v1547_v19, %v3766_v30 }
 0x2e4   : > { %v2142_v54 = vsel %vm1742_vm13, %v2141_v45, %v2137_v55 }
 0x2e5   : > { %v1553_v37 = vpop.permute.xlu1 %1552  ;;  %v1550_v22 = vpop.permute.xlu0 %1549  ;;  %v2147_v32 = vsel %vm1749_vm14, %v2146_v25, %v2142_v54 }
 0x2e6   : > { %v2151_v13 = vrot.slane %v1550_v22, %v3772_v20  ;;  %v2156_v11 = vrot.slane %v1553_v37, %v3662_v18 }
 0x2e8   : > { %v2152_v27 = vsel %vm1756_vm15, %v2151_v13, %v2147_v32 }
 0x2e9   : > { %v4025_v42 = vsel %vm2319_vm0, %v2152_v27, %v2318_v56  ;;  %v1559_v28 = vpop.permute.xlu1 %1558  ;;  %v1556_v33 = vpop.permute.xlu0 %1555 }
 0x2ea   : > { %v2160_v56 = vrot.slane %v1556_v33, %v3658_v61  ;;  %v2165_v41 = vrot.slane %v1559_v28, %v3670_v14 }
 0x2ec   : > { %v2161_v26 = vsel %vm1658_vm1, %v2160_v56, %v2156_v11 }
 0x2ed   : > { %v1565_v62 = vpop.permute.xlu1 %1564  ;;  %v1562_v46 = vpop.permute.xlu0 %1561  ;;  %v2166_v36 = vsel %vm1665_vm2, %v2165_v41, %v2161_v26 }
 0x2ee   : > { %v2170_v58 = vrot.slane %v1562_v46, %v3679_v4  ;;  %v2175_v53 = vrot.slane %v1565_v62, %v3686_v29 }
 0x2f1   : > { %v1571_v44 = vpop.permute.xlu1 %1570  ;;  %v1568_v50 = vpop.permute.xlu0 %1567 }
 0x2f2   : > { %v2180_v10 = vrot.slane %v1568_v50, %v3695_v40 }
 0x2f5   : > { %v1577_v43 = vpop.permute.xlu1 %1576  ;;  %v1574_v35 = vpop.permute.xlu0 %1573 }
 0x2f6   : > { %v2190_v45 = vrot.slane %v1574_v35, %v3710_v17  ;;  %v2195_v22 = vrot.slane %v1577_v43, %v3718_v7 }
 0x2f9   : > { %v4027_v5 = vpop.permute.xlu1 %1582  ;;  %v1580_v60 = vpop.permute.xlu0 %1579 }
 0x2fa   : > { %v2200_v28 = vrot.slane %v1580_v60, %v3723_v9 }
 0x2fd   : > { %v1601_v38 = vpop.permute.xlu1 %1600  ;;  %v4029_v6 = vpop.permute.xlu0 %1585 }
 0x2fe   : > { %v2235_v1 = vrot.slane %v1601_v38, %v3662_v18  ;;  %v2210_v60 = vrot.slane %v4029_v6, %v3742_v52 }
 0x301   : > { %v1607_v49 = vpop.permute.xlu1 %1606  ;;  %v1604_v15 = vpop.permute.xlu0 %1603 }
 0x302   : > { %v2239_v21 = vrot.slane %v1604_v15, %v3658_v61  ;;  %v2244_v59 = vrot.slane %v1607_v49, %v3670_v14  ;;  %v2171_v61 = vsel %vm1672_vm3, %v2170_v58, %v2166_v36  ;;  %v2185_v14 = vrot.slane %v1571_v44, %v3702_v24 }
 0x303   : > { %v2176_v19 = vsel %vm1679_vm4, %v2175_v53, %v2171_v61  ;;  %v2205_v44 = vrot.slane %v4027_v5, %v3734_v16 }
 0x304   : > { %v2240_v0 = vsel %vm1658_vm1, %v2239_v21, %v2235_v1  ;;  %vm4310_vm1 = vmmov %vm4306_vm12 }
 0x305   : > { %v1613_v51 = vpop.permute.xlu1 %1612  ;;  %v1610_v63 = vpop.permute.xlu0 %1609  ;;  %v2245_v18 = vsel %vm1665_vm2, %v2244_v59, %v2240_v0  ;;  %vm4311_vm2 = vmmov %vm4310_vm1 }
 0x306   : > { %v2249_v57 = vrot.slane %v1610_v63, %v3679_v4  ;;  %v2254_v8 = vrot.slane %v1613_v51, %v3686_v29  ;;  %v2181_v4 = vsel %vm1686_vm5, %v2180_v10, %v2176_v19 }
 0x307   : > { %v2186_v13 = vsel %vm1693_vm6, %v2185_v14, %v2181_v4 }
 0x308   : > { %v2250_v55 = vsel %vm1672_vm3, %v2249_v57, %v2245_v18  ;;  %vm2321_vm3 = vcmask 1046534  }
 0x309   : > { %v1619_v48 = vpop.permute.xlu1 %1618  ;;  %v1616_v31 = vpop.permute.xlu0 %1615  ;;  %v2255_v29 = vsel %vm1679_vm4, %v2254_v8, %v2250_v55  ;;  %vm2323_vm4 = vcmask 1047559  }
 0x30a   : > { %v2259_v47 = vrot.slane %v1616_v31, %v3695_v40  ;;  %v2264_v37 = vrot.slane %v1619_v48, %v3702_v24  ;;  %v2191_v40 = vsel %vm1700_vm7, %v2190_v45, %v2186_v13 }
 0x30b   : > { %v2196_v50 = vsel %vm1707_vm8, %v2195_v22, %v2191_v40 }
 0x30c   : > { %v2260_v32 = vsel %vm1686_vm5, %v2259_v47, %v2255_v29  ;;  %v2201_v35 = vsel %vm1714_vm9, %v2200_v28, %v2196_v50 }
 0x30d   : > { %v1625_v12 = vpop.permute.xlu1 %1624  ;;  %v1622_v34 = vpop.permute.xlu0 %1621  ;;  %v2265_v46 = vsel %vm1693_vm6, %v2264_v37, %v2260_v32 }
 0x30e   : > { %v2269_v27 = vrot.slane %v1622_v34, %v3710_v17  ;;  %v2274_v24 = vrot.slane %v1625_v12, %v3718_v7 }
 0x310   : > { %v2270_v43 = vsel %vm1700_vm7, %v2269_v27, %v2265_v46 }
 0x311   : > { %v1631_v3 = vpop.permute.xlu1 %1630  ;;  %v1628_v39 = vpop.permute.xlu0 %1627  ;;  %v2275_v5 = vsel %vm1707_vm8, %v2274_v24, %v2270_v43 }
 0x312   : > { %v2279_v17 = vrot.slane %v1628_v39, %v3723_v9  ;;  %v2284_v15 = vrot.slane %v1631_v3, %v3734_v16  ;;  %v2206_v9 = vsel %vm1721_vm10, %v2205_v44, %v2201_v35 }
 0x313   : > { %v2211_v48 = vsel %vm1728_vm11, %v2210_v60, %v2206_v9 }
 0x314   : > { %v2280_v63 = vsel %vm1714_vm9, %v2279_v17, %v2275_v5 }
 0x315   : > { %v1634_v25 = vpop.permute.xlu1 %1633  ;;  %v1589_v54 = vpop.permute.xlu0 %1588  ;;  %v2285_v58 = vsel %vm1721_vm10, %v2284_v15, %v2280_v63 }
 0x316   : > { %v2215_v7 = vrot.slane %v1589_v54, %v3750_v23  ;;  %v2289_v56 = vrot.slane %v1634_v25, %v3742_v52 }
 0x318   : > { %v2216_v41 = vsel %vm4310_vm1, %v2215_v7, %v2211_v48  ;;  %v2290_v34 = vsel %vm1728_vm11, %v2289_v56, %v2285_v58 }
 0x319   : > { %v1637_v33 = vpop.permute.xlu1 %1636  ;;  %v1592_v62 = vpop.permute.xlu0 %1591 }
 0x31a   : > { %v2220_v51 = vrot.slane %v1592_v62, %v3755_v2  ;;  %v2294_v16 = vrot.slane %v1637_v33, %v3750_v23 }
 0x31c   : > { %v2221_v52 = vsel %vm1742_vm13, %v2220_v51, %v2216_v41  ;;  %v2295_v23 = vsel %vm4311_vm2, %v2294_v16, %v2290_v34 }
 0x31d   : > { %v1640_v38 = vpop.permute.xlu1 %1639  ;;  %v1595_v49 = vpop.permute.xlu0 %1594 }
 0x31e   : > { %v2225_v6 = vrot.slane %v1595_v49, %v3766_v30  ;;  %v2299_v21 = vrot.slane %v1640_v38, %v3755_v2 }
 0x320   : > { %v2226_v1 = vsel %vm1749_vm14, %v2225_v6, %v2221_v52  ;;  %v2300_v2 = vsel %vm1742_vm13, %v2299_v21, %v2295_v23 }
 0x321   : > { %v1643_v31 = vpop.permute.xlu1 %1642  ;;  %v1598_v11 = vpop.permute.xlu0 %1597 }
 0x322   : > { %v2230_v26 = vrot.slane %v1598_v11, %v3772_v20  ;;  %v2304_v12 = vrot.slane %v1643_v31, %v3766_v30 }
 0x324   : > { %v2231_v59 = vsel %vm1756_vm15, %v2230_v26, %v2226_v1  ;;  %v2305_v30 = vsel %vm1749_vm14, %v2304_v12, %v2300_v2 }
 0x325   : > { %v1646_v53 = vpop.permute.xlu0 %1645  ;;  %v2322_v57 = vsel %vm2321_vm3, %v2231_v59, %v4025_v42 }
 0x326   : > { %v2309_v36 = vrot.slane %v1646_v53, %v3772_v20 }
 0x328   : > { %v2310_v0 = vsel %vm1756_vm15, %v2309_v36, %v2305_v30 }
 0x329   : > { %v2324_v61 = vsel %vm2323_vm4, %v2310_v0, %v2322_v57 }
 0x32a   : > { %2326 = vst [vmem:[%s233_s10] sm:$0xff] %v2324_v61 }
 0x32b   : > { %2540 = shalt.err (!%p2537_p5)
}
 0x32c   : > { %s2541_s29 = scalar_lea.hbm %s4106_s21, 128  ;;  %s2545_s9 = scalar_lea.hbm %s4151_s3, 256 }
 0x32d   : > { %p2542_p6 = scmp.ne.s32.totalorder %s4106_s21, %s2541_s29  ;;  %p2546_p10 = scmp.lt.s32.totalorder %s4106_s21, %s4151_s3 }
 0x32e   : > { %p2547_p11 = scmp.lt.s32.totalorder %s2545_s9, %s2541_s29 }
 0x32f   : > { %p2543_p7 = pnand %p2542_p6, %p2667_p4 }
 0x330   : > { %p2548_p12 = por %p2547_p11, %p2546_p10 }
 0x331   : > { %p2544_p9 = pneg %p2543_p7 }
 0x333   : > { %p2549_p13 = pnand %p2548_p12, %p2544_p9 }
 0x335   : > { %2552 = shalt.err (!%p2549_p13)
}
 0x336   : > { %2460 = dma.vmem_to_hbm [thread:$0]  (%p2667_p4), %s2343_s11, 128, %s4106_s21, %s2328_s15  }
 0x337 PF: > { %p2466_p0 = scmp.ge.s32.totalorder %s2603_s17, 2  ;;  %s2354_s7 = sand.u32 1, %s2583_s12  }
 0x338   : > { %s2355_s8 = scalar_lea.sflag [#allocation3], %s2354_s7 }
 0x339   : > { %p2463_p1 = pnand %p2466_p0, %p2674_p8 }
 0x33b   : > { %p2464_p2 = pneg %p2463_p1 }
 0x33d   : > { %2578 = dma.done.wait (%p2464_p2), %s2355_s8, 128  }
 0x33e   : > { %2580 = vsyncadd (%p2464_p2), %s2355_s8, 4294967168  ;;  %s16_s17 = sadd.s32 1, %s2603_s17   ;;  %s4312_s12 = smov %s2587_s13 }
 0x33f   : > { %p13_p3 = scmp.ge.s32.totalorder %s16_s17, 4   ;;  %s4313_s13 = smov %s2591_s14 }
 0x340   : > { %s4314_s14 = smov %s2680_s25  ;;  %s4315_s15 = smov %s2599_s16 }
 0x341   : > { %s4316_s16 = smov %s4318_s20  ;;  %15 = sbr.rel (!%p13_p3) target bundleno = 4 (0x4), region = 73 }
 0x346   :  { %2360 = vsyncpa [#allocation3], 1 }
 0x347   :  { %2362 = vsyncpa [#allocation3 + $0x1], 1 }

</bundles_post_ra>
